<compile_context>
chip_gen: v6e
topology: v6e:2x2x1
jax: 0.10.0
libtpu: 0.0.40
codegen_flags: <defaults>
</compile_context>

<pallas_src>
import functools
import math

import jax
import jax.numpy as jnp
from jax.experimental import pallas as pl
from jax.experimental.pallas import tpu as pltpu


def _memattn_kernel(q_ref, kt_ref, v_ref, wq_ref, wr_ref, b_ref, mbias_ref,
                    qout_ref, attn_ref, *, nhop, apply_mask):
    f32 = jnp.float32
    bt, lq, d = q_ref.shape
    lk = v_ref.shape[1]
    mxu_dtype = kt_ref.dtype
    low_precision = mxu_dtype != f32
    rows = bt * lq

    # Loop-invariant loads, hoisted out of the hop loop.  The 1/sqrt(D) scale
    # is already folded into K in the wrapper; K arrives pre-transposed as
    # (bt, D, Lk) so the score matmul is MXU-native (no per-hop transpose,
    # no per-step VPU rescale, no f32 K copy).
    kt = kt_ref[...]                                    # (bt, d, lk)
    v = v_ref[...]                                      # (bt, lk, d)
    wq = wq_ref[...]                                    # (d, d)
    wr = wr_ref[...]                                    # (d, d)
    b_row = b_ref[...].astype(f32)                      # (1, d), VPU broadcast
    if apply_mask:
        mbias = mbias_ref[...].astype(f32).reshape(1, 1, lk)  # -1e30 on pads

    def hop(q_hop, want_attn):
        q_lo = q_hop.astype(mxu_dtype)
        s = jnp.einsum("bqd,bdk->bqk", q_lo, kt,
                       preferred_element_type=f32)      # (bt, lq, lk)
        if apply_mask:
            s = s + mbias
        m = jnp.max(s, axis=-1, keepdims=True)
        e = jnp.exp(s - m)
        l = jnp.sum(e, axis=-1, keepdims=True)          # (bt, lq, 1)
        # attn is a user-visible output: exact reciprocal on the final hop so
        # rows sum to 1 up to f32 rounding; intermediate hops may use the EUP
        # approx reciprocal when MXU operands are low precision.
        if want_attn or not low_precision:
            l_inv = 1.0 / l
        else:
            l_inv = pl.reciprocal(l, approx=True)
        # Normalize R (Lq*D mults) instead of the full attn matrix (Lq*Lk).
        r = jnp.einsum("bqk,bkd->bqd", e.astype(mxu_dtype), v,
                       preferred_element_type=f32) * l_inv
        # Linear([Q_hop, R]) as a split matmul with batch folded into rows so
        # the MXU sees (bt*lq, d) @ (d, d) slabs.
        q2 = q_lo.reshape(rows, d)
        r2 = r.reshape(rows, d).astype(mxu_dtype)
        h = (jnp.dot(q2, wq, preferred_element_type=f32)
             + jnp.dot(r2, wr, preferred_element_type=f32)
             + b_row)                                    # (1,d) broadcasts free
        new_q = jnp.tanh(h).reshape(bt, lq, d)
        attn = (e * l_inv) if want_attn else None
        return new_q, attn

    q_hop = q_ref[...].astype(f32)

    n_pre = nhop - 1
    if n_pre > 0:
        if n_pre <= 2:
            # Tiny hop counts: unroll at trace time.
            for _ in range(n_pre):
                q_hop, _ = hop(q_hop, False)
        else:
            # Real loop bounds the (bt,lq,lk) f32 temporaries' live ranges.
            q_hop = jax.lax.fori_loop(
                0, n_pre, lambda _, q: hop(q, False)[0], q_hop)

    # Final hop also materializes the normalized attention matrix (output).
    q_hop, attn = hop(q_hop, True)

    qout_ref[...] = q_hop.astype(qout_ref.dtype)
    attn_ref[...] = attn.astype(attn_ref.dtype)


def _round_up(x, m):
    return ((x + m - 1) // m) * m


def _vmem_budget_and_limit():
    """Generation-aware VMEM sizing: scoped limit ~3/4 of per-core VMEM
    (≈48 MiB on 64 MiB v7x parts, ≈96 MiB on 128 MiB v5e/v6e parts), tile
    budget = half the limit."""
    cap = 64 * 1024 * 1024
    try:
        cap = int(pltpu.get_tpu_info().vmem_capacity_bytes)
    except Exception:
        pass
    limit = min((cap * 3) // 4, 100 * 1024 * 1024)
    return limit // 2, limit


def _pick_q_tile(Lq, preferred=512):
    """Full extent for small Lq; otherwise the largest divisor <= preferred
    that is a multiple of 256 (MXU row slab), then 128, then 8."""
    if Lq <= preferred:
        return Lq
    for align in (256, 128, 8):
        start = preferred - (preferred % align)
        for t in range(start, align - 1, -align):
            if Lq % t == 0:
                return t
    return Lq


def _pick_batch_tile(B, Lq_t, Lk_p, D_p, in_itemsize, mxu_itemsize,
                     attn_itemsize, budget_bytes):
    """Largest divisor of B whose per-step VMEM footprint fits the budget,
    including the live f32 hop temporaries."""
    per_b = 2 * (Lq_t * D_p * in_itemsize          # Q block (double-buffered)
                 + 2 * Lk_p * D_p * mxu_itemsize   # K^T and V blocks
                 + Lq_t * D_p * in_itemsize        # Q_hop output block
                 + Lq_t * Lk_p * attn_itemsize)    # attn output block
    # f32 temporaries (scores/exp + r/h/q_hop); ~2 hops' worth live at once.
    per_b += 2 * (2 * Lq_t * Lk_p * 4 + 3 * Lq_t * D_p * 4)
    bt = max(1, min(B, budget_bytes // max(per_b, 1)))
    while B % bt:
        bt -= 1
    return bt


def mem_attn(Q, K, V, W, b, *, nhop, mxu_dtype=jnp.bfloat16,
             attn_dtype=jnp.float32, batch_tile=None, q_tile=None,
             lane_pad=True):
    """Pallas MemAttn forward.

    Q: (B, Lq, D), K/V: (B, Lk, D), W: (D, 2D) torch nn.Linear weight, b: (D,).
    mxu_dtype: MXU operand dtype (bf16 default — the fast path on v5e/v6e/v7x);
      accumulation and softmax/tanh math stay float32.
    attn_dtype: output dtype for the attention weights (f32 default; pass a
      narrower dtype to halve the dominant HBM writeback).
    Returns (Q_hop, attn_weights) with shapes (B, Lq, D), (B, Lq, Lk).
    """
    if nhop < 1:
        raise ValueError("nhop must be >= 1 (the module returns the last "
                         "hop's attention weights)")

    f32 = jnp.float32
    B, Lq, D = Q.shape
    Lk = K.shape[1]
    mxu_dtype = jnp.dtype(mxu_dtype)
    attn_dtype = jnp.dtype(attn_dtype)

    # Lane-dense padding: last dims of the stored blocks (D for Q_hop, Lk for
    # attn) become multiples of 128 -> unmasked vst, no relayout copies.
    Dp = _round_up(D, 128) if lane_pad else D
    Lk_p = _round_up(Lk, 128) if lane_pad else Lk
    apply_mask = Lk_p != Lk

    scale = 1.0 / math.sqrt(float(D))

    # One-time XLA-side prep: fold 1/sqrt(D) into K, zero-pad D/Lk, pre-
    # transpose K to (B, D, Lk), cast MXU operands once (halves K/V/W traffic
    # in bf16 mode).
    Kf = jnp.pad(K.astype(f32) * scale,
                 ((0, 0), (0, Lk_p - Lk), (0, Dp - D)))
    Kt = jnp.transpose(Kf, (0, 2, 1)).astype(mxu_dtype)            # (B,Dp,Lkp)
    Vc = jnp.pad(V.astype(f32),
                 ((0, 0), (0, Lk_p - Lk), (0, Dp - D))).astype(mxu_dtype)
    Qp = jnp.pad(Q, ((0, 0), (0, 0), (0, Dp - D)))
    Wq_t = jnp.pad(jnp.transpose(W[:, :D]).astype(f32),
                   ((0, Dp - D), (0, Dp - D))).astype(mxu_dtype)   # (Dp, Dp)
    Wr_t = jnp.pad(jnp.transpose(W[:, D:]).astype(f32),
                   ((0, Dp - D), (0, Dp - D))).astype(mxu_dtype)   # (Dp, Dp)
    b2 = jnp.pad(b.astype(f32), (0, Dp - D)).reshape(1, Dp)
    # Score bias: 0 on real keys, -1e30 on padded keys (softmax weight -> 0).
    mask = jnp.where(jnp.arange(Lk_p) < Lk, 0.0, -1e30
                     ).astype(f32).reshape(1, Lk_p)

    budget_bytes, vmem_limit = _vmem_budget_and_limit()

    auto_tiles = batch_tile is None and q_tile is None
    if q_tile is None:
        q_tile = _pick_q_tile(Lq)
    if batch_tile is None:
        batch_tile = _pick_batch_tile(
            B, q_tile, Lk_p, Dp, jnp.dtype(Q.dtype).itemsize,
            mxu_dtype.itemsize, attn_dtype.itemsize, budget_bytes)

    # v7x has 2 TensorCores: keep >= 2 iterations along a "parallel" grid axis
    # whenever the problem allows, so both cores get work.
    if auto_tiles and (B // batch_tile) * (Lq // q_tile) < 2:
        if B >= 2:
            bt = B // 2
            while B % bt:
                bt -= 1
            batch_tile = bt
        else:
            for t in range(Lq // 2, 7, -1):
                if Lq % t == 0 and t % 8 == 0:
                    q_tile = t
                    break

    grid = (B // batch_tile, Lq // q_tile)

    kernel = functools.partial(_memattn_kernel, nhop=nhop,
                               apply_mask=apply_mask)

    out_shapes = (
        jax.ShapeDtypeStruct((B, Lq, Dp), Q.dtype),
        jax.ShapeDtypeStruct((B, Lq, Lk_p), attn_dtype),
    )

    q_out, attn_out = pl.pallas_call(
        kernel,
        out_shape=out_shapes,
        grid_spec=pltpu.PrefetchScalarGridSpec(
            num_scalar_prefetch=0,
            grid=grid,
            in_specs=[
                pl.BlockSpec((batch_tile, q_tile, Dp), lambda bi, qi: (bi, qi, 0)),
                pl.BlockSpec((batch_tile, Dp, Lk_p), lambda bi, qi: (bi, 0, 0)),
                pl.BlockSpec((batch_tile, Lk_p, Dp), lambda bi, qi: (bi, 0, 0)),
                pl.BlockSpec((Dp, Dp), lambda bi, qi: (0, 0)),
                pl.BlockSpec((Dp, Dp), lambda bi, qi: (0, 0)),
                pl.BlockSpec((1, Dp), lambda bi, qi: (0, 0)),
                pl.BlockSpec((1, Lk_p), lambda bi, qi: (0, 0)),
            ],
            out_specs=[
                pl.BlockSpec((batch_tile, q_tile, Dp), lambda bi, qi: (bi, qi, 0)),
                pl.BlockSpec((batch_tile, q_tile, Lk_p), lambda bi, qi: (bi, qi, 0)),
            ],
        ),
        compiler_params=pltpu.CompilerParams(
            dimension_semantics=("parallel", "parallel"),
            vmem_limit_bytes=vmem_limit,
        ),
    )(Qp, Kt, Vc, Wq_t, Wr_t, b2, mask)

    if Dp != D:
        q_out = q_out[:, :, :D]
    if Lk_p != Lk:
        attn_out = attn_out[:, :, :Lk]
    return q_out, attn_out


def mem_attn_ref(Q, K, V, W, b, *, nhop):
    """Pure-JAX reference mirroring the PyTorch forward (f32 math)."""
    D = Q.shape[-1]
    q_hop = Q.astype(jnp.float32)
    Kf = K.astype(jnp.float32)
    Vf = V.astype(jnp.float32)
    attn = None
    for _ in range(nhop):
        s = jnp.einsum("bqd,bkd->bqk", q_hop, Kf) / jnp.sqrt(jnp.float32(D))
        attn = jax.nn.softmax(s, axis=2)
        r = jnp.einsum("bqk,bkd->bqd", attn, Vf)
        cat = jnp.concatenate([q_hop, r], axis=2)
        q_hop = jnp.tanh(jnp.einsum("bqe,de->bqd", cat, W.astype(jnp.float32))
                         + b.astype(jnp.float32))
    return q_hop, attn


if __name__ == "__main__":
    # Small shapes consistent with the module: (B, L, D) inputs.
    B, Lq, Lk, D, NHOP = 2, 8, 8, 32, 3

    key = jax.random.PRNGKey(0)
    kq, kk, kv, kw, kb = jax.random.split(key, 5)

    Q = jax.random.normal(kq, (B, Lq, D), dtype=jnp.float32)
    K = jax.random.normal(kk, (B, Lk, D), dtype=jnp.float32)
    V = jax.random.normal(kv, (B, Lk, D), dtype=jnp.float32)

    # Deterministic nn.Linear(2D, D) parameters (torch-default-like init).
    bound = 1.0 / math.sqrt(2 * D)
    W = jax.random.uniform(kw, (D, 2 * D), minval=-bound, maxval=bound,
                           dtype=jnp.float32)
    bvec = jax.random.uniform(kb, (D,), minval=-bound, maxval=bound,
                              dtype=jnp.float32)

    q_gold, attn_gold = mem_attn_ref(Q, K, V, W, bvec, nhop=NHOP)

    # f32 MXU operands: tight check against the f32 reference (also exercises
    # the lane-padding + key-masking path since D=32, Lk=8 pad to 128).
    q_f32, attn_f32 = mem_attn(Q, K, V, W, bvec, nhop=NHOP,
                               mxu_dtype=jnp.float32)
    jax.block_until_ready((q_f32, attn_f32))
    assert q_f32.shape == (B, Lq, D) and attn_f32.shape == (B, Lq, Lk)
    assert jnp.allclose(q_f32, q_gold, atol=1e-5, rtol=1e-5)
    assert jnp.allclose(attn_f32, attn_gold, atol=1e-5, rtol=1e-5)

    # Default path: bf16 MXU operands (fast path on v5e/v6e/v7x) with f32
    # accumulation + f32 softmax/tanh; coarse check against the f32 reference.
    q_bf, attn_bf = mem_attn(Q, K, V, W, bvec, nhop=NHOP)
    jax.block_until_ready((q_bf, attn_bf))
    assert q_bf.shape == (B, Lq, D) and attn_bf.shape == (B, Lq, Lk)
    assert bool(jnp.all(jnp.isfinite(q_bf)))
    assert bool(jnp.all(jnp.isfinite(attn_bf)))
    assert jnp.allclose(q_bf, q_gold, atol=1e-1, rtol=1e-1)
    assert jnp.allclose(attn_bf, attn_gold, atol=1e-1, rtol=1e-1)

    print("KERNEL_OK")
</pallas_src>

<mosaic_0001>
module attributes {stable_mosaic.version = 11 : i64} {
  func.func @_memattn_kernel(%arg0: i32, %arg1: i32, %arg2: memref<1x8x128xf32, #tpu.memory_space<vmem>>, %arg3: memref<1x128x128xf32, #tpu.memory_space<vmem>>, %arg4: memref<1x128x128xf32, #tpu.memory_space<vmem>>, %arg5: memref<128x128xf32, #tpu.memory_space<vmem>>, %arg6: memref<128x128xf32, #tpu.memory_space<vmem>>, %arg7: memref<1x128xf32, #tpu.memory_space<vmem>>, %arg8: memref<1x128xf32, #tpu.memory_space<vmem>>, %arg9: memref<1x8x128xf32, #tpu.memory_space<vmem>>, %arg10: memref<1x8x128xf32, #tpu.memory_space<vmem>>) attributes {dimension_semantics = [#tpu.dimension_semantics<parallel>, #tpu.dimension_semantics<parallel>], iteration_bounds = array<i64: 2, 1>, scalar_prefetch = 0 : i64, scratch_operands = 0 : i64, tpu.core_type = #tpu.core_type<tc>, window_params = [{transform_indices = @transform_0, window_bounds = array<i64: 1, 8, 128>}, {transform_indices = @transform_1, window_bounds = array<i64: 1, 128, 128>}, {transform_indices = @transform_2, window_bounds = array<i64: 1, 128, 128>}, {pipeline_mode = #tpu.pipeline_mode<synchronous>, transform_indices = @transform_3, window_bounds = array<i64: 128, 128>}, {pipeline_mode = #tpu.pipeline_mode<synchronous>, transform_indices = @transform_4, window_bounds = array<i64: 128, 128>}, {pipeline_mode = #tpu.pipeline_mode<synchronous>, transform_indices = @transform_5, window_bounds = array<i64: 1, 128>}, {pipeline_mode = #tpu.pipeline_mode<synchronous>, transform_indices = @transform_6, window_bounds = array<i64: 1, 128>}, {transform_indices = @transform_7, window_bounds = array<i64: 1, 8, 128>}, {transform_indices = @transform_8, window_bounds = array<i64: 1, 8, 128>}]} {
    %c0 = arith.constant 0 : index
    %c0_0 = arith.constant 0 : index
    %c0_1 = arith.constant 0 : index
    %0 = vector.load %arg3[%c0, %c0_0, %c0_1] : memref<1x128x128xf32, #tpu.memory_space<vmem>>, vector<1x128x128xf32>
    %c0_2 = arith.constant 0 : index
    %c0_3 = arith.constant 0 : index
    %c0_4 = arith.constant 0 : index
    %1 = vector.load %arg4[%c0_2, %c0_3, %c0_4] : memref<1x128x128xf32, #tpu.memory_space<vmem>>, vector<1x128x128xf32>
    %c0_5 = arith.constant 0 : index
    %c0_6 = arith.constant 0 : index
    %2 = vector.load %arg5[%c0_5, %c0_6] : memref<128x128xf32, #tpu.memory_space<vmem>>, vector<128x128xf32>
    %c0_7 = arith.constant 0 : index
    %c0_8 = arith.constant 0 : index
    %3 = vector.load %arg6[%c0_7, %c0_8] : memref<128x128xf32, #tpu.memory_space<vmem>>, vector<128x128xf32>
    %c0_9 = arith.constant 0 : index
    %c0_10 = arith.constant 0 : index
    %4 = vector.load %arg7[%c0_9, %c0_10] : memref<1x128xf32, #tpu.memory_space<vmem>>, vector<1x128xf32>
    %c0_11 = arith.constant 0 : index
    %c0_12 = arith.constant 0 : index
    %5 = vector.load %arg8[%c0_11, %c0_12] : memref<1x128xf32, #tpu.memory_space<vmem>>, vector<1x128xf32>
    %6 = vector.shape_cast %5 : vector<1x128xf32> to vector<1x1x128xf32>
    %c0_13 = arith.constant 0 : index
    %c0_14 = arith.constant 0 : index
    %c0_15 = arith.constant 0 : index
    %7 = vector.load %arg2[%c0_13, %c0_14, %c0_15] : memref<1x8x128xf32, #tpu.memory_space<vmem>>, vector<1x8x128xf32>
    "tpu.trace_start"() <{level = 10 : i32, message = "bqd,bdk->bqk"}> : () -> ()
    %cst = arith.constant dense<0.000000e+00> : vector<1x8x128xf32>
    %8 = tpu.matmul %7, %0, %cst {dimension_numbers = #tpu.dot_dimension_numbers<[2], [1], [1], [2], [0, 0, 0, 1, 1, 2], [0], [0]>} : vector<1x8x128xf32>, vector<1x128x128xf32>, vector<1x8x128xf32> -> vector<1x8x128xf32>
    "tpu.trace_stop"() : () -> ()
    %9 = vector.broadcast %6 : vector<1x1x128xf32> to vector<1x8x128xf32>
    %10 = arith.addf %8, %9 : vector<1x8x128xf32>
    %cst_16 = arith.constant dense<0xFF800000> : vector<1x8xf32>
    %11 = vector.multi_reduction <maximumf>, %10, %cst_16 [2] : vector<1x8x128xf32> to vector<1x8xf32>
    %12 = vector.shape_cast %11 : vector<1x8xf32> to vector<1x8x1xf32>
    %13 = vector.broadcast %12 : vector<1x8x1xf32> to vector<1x8x128xf32>
    %14 = arith.subf %10, %13 : vector<1x8x128xf32>
    %15 = math.exp %14 : vector<1x8x128xf32>
    %cst_17 = arith.constant dense<0.000000e+00> : vector<1x8xf32>
    %16 = vector.multi_reduction <add>, %15, %cst_17 [2] : vector<1x8x128xf32> to vector<1x8xf32>
    %17 = vector.shape_cast %16 : vector<1x8xf32> to vector<1x8x1xf32>
    %cst_18 = arith.constant 1.000000e+00 : f32
    %18 = vector.broadcast %cst_18 : f32 to vector<1x8x1xf32>
    %19 = arith.divf %18, %17 : vector<1x8x1xf32>
    "tpu.trace_start"() <{level = 10 : i32, message = "bqk,bkd->bqd"}> : () -> ()
    %cst_19 = arith.constant dense<0.000000e+00> : vector<1x8x128xf32>
    %20 = tpu.matmul %15, %1, %cst_19 {dimension_numbers = #tpu.dot_dimension_numbers<[2], [1], [1], [2], [0, 0, 0, 1, 1, 2], [0], [0]>} : vector<1x8x128xf32>, vector<1x128x128xf32>, vector<1x8x128xf32> -> vector<1x8x128xf32>
    "tpu.trace_stop"() : () -> ()
    %21 = vector.broadcast %19 : vector<1x8x1xf32> to vector<1x8x128xf32>
    %22 = arith.mulf %20, %21 : vector<1x8x128xf32>
    %23 = vector.shape_cast %7 : vector<1x8x128xf32> to vector<8x128xf32>
    %24 = vector.shape_cast %22 : vector<1x8x128xf32> to vector<8x128xf32>
    %cst_20 = arith.constant dense<0.000000e+00> : vector<8x128xf32>
    %25 = tpu.matmul %23, %2, %cst_20 {dimension_numbers = #tpu.dot_dimension_numbers<[1], [0], [0], [1], [0, 0, 1, 1], [], []>} : vector<8x128xf32>, vector<128x128xf32>, vector<8x128xf32> -> vector<8x128xf32>
    %cst_21 = arith.constant dense<0.000000e+00> : vector<8x128xf32>
    %26 = tpu.matmul %24, %3, %cst_21 {dimension_numbers = #tpu.dot_dimension_numbers<[1], [0], [0], [1], [0, 0, 1, 1], [], []>} : vector<8x128xf32>, vector<128x128xf32>, vector<8x128xf32> -> vector<8x128xf32>
    %27 = arith.addf %25, %26 : vector<8x128xf32>
    %28 = vector.broadcast %4 : vector<1x128xf32> to vector<8x128xf32>
    %29 = arith.addf %27, %28 : vector<8x128xf32>
    %30 = math.tanh %29 : vector<8x128xf32>
    %31 = vector.shape_cast %30 : vector<8x128xf32> to vector<1x8x128xf32>
    "tpu.trace_start"() <{level = 10 : i32, message = "bqd,bdk->bqk"}> : () -> ()
    %cst_22 = arith.constant dense<0.000000e+00> : vector<1x8x128xf32>
    %32 = tpu.matmul %31, %0, %cst_22 {dimension_numbers = #tpu.dot_dimension_numbers<[2], [1], [1], [2], [0, 0, 0, 1, 1, 2], [0], [0]>} : vector<1x8x128xf32>, vector<1x128x128xf32>, vector<1x8x128xf32> -> vector<1x8x128xf32>
    "tpu.trace_stop"() : () -> ()
    %33 = vector.broadcast %6 : vector<1x1x128xf32> to vector<1x8x128xf32>
    %34 = arith.addf %32, %33 : vector<1x8x128xf32>
    %cst_23 = arith.constant dense<0xFF800000> : vector<1x8xf32>
    %35 = vector.multi_reduction <maximumf>, %34, %cst_23 [2] : vector<1x8x128xf32> to vector<1x8xf32>
    %36 = vector.shape_cast %35 : vector<1x8xf32> to vector<1x8x1xf32>
    %37 = vector.broadcast %36 : vector<1x8x1xf32> to vector<1x8x128xf32>
    %38 = arith.subf %34, %37 : vector<1x8x128xf32>
    %39 = math.exp %38 : vector<1x8x128xf32>
    %cst_24 = arith.constant dense<0.000000e+00> : vector<1x8xf32>
    %40 = vector.multi_reduction <add>, %39, %cst_24 [2] : vector<1x8x128xf32> to vector<1x8xf32>
    %41 = vector.shape_cast %40 : vector<1x8xf32> to vector<1x8x1xf32>
    %cst_25 = arith.constant 1.000000e+00 : f32
    %42 = vector.broadcast %cst_25 : f32 to vector<1x8x1xf32>
    %43 = arith.divf %42, %41 : vector<1x8x1xf32>
    "tpu.trace_start"() <{level = 10 : i32, message = "bqk,bkd->bqd"}> : () -> ()
    %cst_26 = arith.constant dense<0.000000e+00> : vector<1x8x128xf32>
    %44 = tpu.matmul %39, %1, %cst_26 {dimension_numbers = #tpu.dot_dimension_numbers<[2], [1], [1], [2], [0, 0, 0, 1, 1, 2], [0], [0]>} : vector<1x8x128xf32>, vector<1x128x128xf32>, vector<1x8x128xf32> -> vector<1x8x128xf32>
    "tpu.trace_stop"() : () -> ()
    %45 = vector.broadcast %43 : vector<1x8x1xf32> to vector<1x8x128xf32>
    %46 = arith.mulf %44, %45 : vector<1x8x128xf32>
    %47 = vector.shape_cast %31 : vector<1x8x128xf32> to vector<8x128xf32>
    %48 = vector.shape_cast %46 : vector<1x8x128xf32> to vector<8x128xf32>
    %cst_27 = arith.constant dense<0.000000e+00> : vector<8x128xf32>
    %49 = tpu.matmul %47, %2, %cst_27 {dimension_numbers = #tpu.dot_dimension_numbers<[1], [0], [0], [1], [0, 0, 1, 1], [], []>} : vector<8x128xf32>, vector<128x128xf32>, vector<8x128xf32> -> vector<8x128xf32>
    %cst_28 = arith.constant dense<0.000000e+00> : vector<8x128xf32>
    %50 = tpu.matmul %48, %3, %cst_28 {dimension_numbers = #tpu.dot_dimension_numbers<[1], [0], [0], [1], [0, 0, 1, 1], [], []>} : vector<8x128xf32>, vector<128x128xf32>, vector<8x128xf32> -> vector<8x128xf32>
    %51 = arith.addf %49, %50 : vector<8x128xf32>
    %52 = vector.broadcast %4 : vector<1x128xf32> to vector<8x128xf32>
    %53 = arith.addf %51, %52 : vector<8x128xf32>
    %54 = math.tanh %53 : vector<8x128xf32>
    %55 = vector.shape_cast %54 : vector<8x128xf32> to vector<1x8x128xf32>
    "tpu.trace_start"() <{level = 10 : i32, message = "bqd,bdk->bqk"}> : () -> ()
    %cst_29 = arith.constant dense<0.000000e+00> : vector<1x8x128xf32>
    %56 = tpu.matmul %55, %0, %cst_29 {dimension_numbers = #tpu.dot_dimension_numbers<[2], [1], [1], [2], [0, 0, 0, 1, 1, 2], [0], [0]>} : vector<1x8x128xf32>, vector<1x128x128xf32>, vector<1x8x128xf32> -> vector<1x8x128xf32>
    "tpu.trace_stop"() : () -> ()
    %57 = vector.broadcast %6 : vector<1x1x128xf32> to vector<1x8x128xf32>
    %58 = arith.addf %56, %57 : vector<1x8x128xf32>
    %cst_30 = arith.constant dense<0xFF800000> : vector<1x8xf32>
    %59 = vector.multi_reduction <maximumf>, %58, %cst_30 [2] : vector<1x8x128xf32> to vector<1x8xf32>
    %60 = vector.shape_cast %59 : vector<1x8xf32> to vector<1x8x1xf32>
    %61 = vector.broadcast %60 : vector<1x8x1xf32> to vector<1x8x128xf32>
    %62 = arith.subf %58, %61 : vector<1x8x128xf32>
    %63 = math.exp %62 : vector<1x8x128xf32>
    %cst_31 = arith.constant dense<0.000000e+00> : vector<1x8xf32>
    %64 = vector.multi_reduction <add>, %63, %cst_31 [2] : vector<1x8x128xf32> to vector<1x8xf32>
    %65 = vector.shape_cast %64 : vector<1x8xf32> to vector<1x8x1xf32>
    %cst_32 = arith.constant 1.000000e+00 : f32
    %66 = vector.broadcast %cst_32 : f32 to vector<1x8x1xf32>
    %67 = arith.divf %66, %65 : vector<1x8x1xf32>
    "tpu.trace_start"() <{level = 10 : i32, message = "bqk,bkd->bqd"}> : () -> ()
    %cst_33 = arith.constant dense<0.000000e+00> : vector<1x8x128xf32>
    %68 = tpu.matmul %63, %1, %cst_33 {dimension_numbers = #tpu.dot_dimension_numbers<[2], [1], [1], [2], [0, 0, 0, 1, 1, 2], [0], [0]>} : vector<1x8x128xf32>, vector<1x128x128xf32>, vector<1x8x128xf32> -> vector<1x8x128xf32>
    "tpu.trace_stop"() : () -> ()
    %69 = vector.broadcast %67 : vector<1x8x1xf32> to vector<1x8x128xf32>
    %70 = arith.mulf %68, %69 : vector<1x8x128xf32>
    %71 = vector.shape_cast %55 : vector<1x8x128xf32> to vector<8x128xf32>
    %72 = vector.shape_cast %70 : vector<1x8x128xf32> to vector<8x128xf32>
    %cst_34 = arith.constant dense<0.000000e+00> : vector<8x128xf32>
    %73 = tpu.matmul %71, %2, %cst_34 {dimension_numbers = #tpu.dot_dimension_numbers<[1], [0], [0], [1], [0, 0, 1, 1], [], []>} : vector<8x128xf32>, vector<128x128xf32>, vector<8x128xf32> -> vector<8x128xf32>
    %cst_35 = arith.constant dense<0.000000e+00> : vector<8x128xf32>
    %74 = tpu.matmul %72, %3, %cst_35 {dimension_numbers = #tpu.dot_dimension_numbers<[1], [0], [0], [1], [0, 0, 1, 1], [], []>} : vector<8x128xf32>, vector<128x128xf32>, vector<8x128xf32> -> vector<8x128xf32>
    %75 = arith.addf %73, %74 : vector<8x128xf32>
    %76 = vector.broadcast %4 : vector<1x128xf32> to vector<8x128xf32>
    %77 = arith.addf %75, %76 : vector<8x128xf32>
    %78 = math.tanh %77 : vector<8x128xf32>
    %79 = vector.shape_cast %78 : vector<8x128xf32> to vector<1x8x128xf32>
    %80 = vector.broadcast %67 : vector<1x8x1xf32> to vector<1x8x128xf32>
    %81 = arith.mulf %63, %80 : vector<1x8x128xf32>
    %c0_36 = arith.constant 0 : index
    %c0_37 = arith.constant 0 : index
    %c0_38 = arith.constant 0 : index
    %82 = vector.load %arg9[%c0_36, %c0_37, %c0_38] : memref<1x8x128xf32, #tpu.memory_space<vmem>>, vector<1x8x128xf32>
    tpu.vector_store %arg9[%c0_36, %c0_37, %c0_38], %79 {strides = array<i32>} : memref<1x8x128xf32, #tpu.memory_space<vmem>>, vector<1x8x128xf32>,
    %c0_39 = arith.constant 0 : index
    %c0_40 = arith.constant 0 : index
    %c0_41 = arith.constant 0 : index
    %83 = vector.load %arg10[%c0_39, %c0_40, %c0_41] : memref<1x8x128xf32, #tpu.memory_space<vmem>>, vector<1x8x128xf32>
    tpu.vector_store %arg10[%c0_39, %c0_40, %c0_41], %81 {strides = array<i32>} : memref<1x8x128xf32, #tpu.memory_space<vmem>>, vector<1x8x128xf32>,
    return
  }
  func.func @transform_0(%arg0: i32, %arg1: i32) -> (i32, i32, i32) {
    %c0_i32 = arith.constant 0 : i32
    %c0_i32_0 = arith.constant 0 : i32
    return %arg0, %arg1, %c0_i32 : i32, i32, i32
  }
  func.func @transform_1(%arg0: i32, %arg1: i32) -> (i32, i32, i32) {
    %c0_i32 = arith.constant 0 : i32
    %c0_i32_0 = arith.constant 0 : i32
    %c0_i32_1 = arith.constant 0 : i32
    return %arg0, %c0_i32, %c0_i32_0 : i32, i32, i32
  }
  func.func @transform_2(%arg0: i32, %arg1: i32) -> (i32, i32, i32) {
    %c0_i32 = arith.constant 0 : i32
    %c0_i32_0 = arith.constant 0 : i32
    %c0_i32_1 = arith.constant 0 : i32
    return %arg0, %c0_i32, %c0_i32_0 : i32, i32, i32
  }
  func.func @transform_3(%arg0: i32, %arg1: i32) -> (i32, i32) {
    %c0_i32 = arith.constant 0 : i32
    %c0_i32_0 = arith.constant 0 : i32
    %c0_i32_1 = arith.constant 0 : i32
    return %c0_i32, %c0_i32_0 : i32, i32
  }
  func.func @transform_4(%arg0: i32, %arg1: i32) -> (i32, i32) {
    %c0_i32 = arith.constant 0 : i32
    %c0_i32_0 = arith.constant 0 : i32
    %c0_i32_1 = arith.constant 0 : i32
    return %c0_i32, %c0_i32_0 : i32, i32
  }
  func.func @transform_5(%arg0: i32, %arg1: i32) -> (i32, i32) {
    %c0_i32 = arith.constant 0 : i32
    %c0_i32_0 = arith.constant 0 : i32
    %c0_i32_1 = arith.constant 0 : i32
    return %c0_i32, %c0_i32_0 : i32, i32
  }
  func.func @transform_6(%arg0: i32, %arg1: i32) -> (i32, i32) {
    %c0_i32 = arith.constant 0 : i32
    %c0_i32_0 = arith.constant 0 : i32
    %c0_i32_1 = arith.constant 0 : i32
    return %c0_i32, %c0_i32_0 : i32, i32
  }
  func.func @transform_7(%arg0: i32, %arg1: i32) -> (i32, i32, i32) {
    %c0_i32 = arith.constant 0 : i32
    %c0_i32_0 = arith.constant 0 : i32
    return %arg0, %arg1, %c0_i32 : i32, i32, i32
  }
  func.func @transform_8(%arg0: i32, %arg1: i32) -> (i32, i32, i32) {
    %c0_i32 = arith.constant 0 : i32
    %c0_i32_0 = arith.constant 0 : i32
    return %arg0, %arg1, %c0_i32 : i32, i32, i32
  }
}

</mosaic_0001>

<bundles_post_ra>
// kernel: tpu_custom_call.1
= control target key start
LH: loop header
LB: loop body
LE: loop exit
PB: predicated region body
PF: predicated region fallthrough
CT: control target
= control target key end

     0   :  { %s3584_s0 = inlined_call_operand.hbm [shape: f32[2,8,128], index: 0, kind: input, shape index: {}]   ;;  %s3585_s1 = inlined_call_operand.hbm [shape: f32[2,128,128], index: 1, kind: input, shape index: {}]   ;;  %s3586_s2 = inlined_call_operand.hbm [shape: f32[2,128,128], index: 2, kind: input, shape index: {}]   ;;  %s3587_s3 = inlined_call_operand.hbm [shape: f32[128,128], index: 3, kind: input, shape index: {}]   ;;  %s3588_s4 = inlined_call_operand.hbm [shape: f32[128,128], index: 4, kind: input, shape index: {}]   ;;  %s3589_s5 = inlined_call_operand.vmem [shape: f32[1,128], index: 5, kind: input, shape index: {}]   ;;  %s3590_s6 = inlined_call_operand.vmem [shape: f32[1,128], index: 6, kind: input, shape index: {}]   ;;  %s3591_s7 = inlined_call_operand.hbm [shape: f32[2,8,128], index: 7, kind: output, shape index: {0}]   ;;  %s3592_s8 = inlined_call_operand.hbm [shape: f32[2,8,128], index: 8, kind: output, shape index: {1}]  }
   0x1   :  { %3619 = sst [smem:[#allocation35_spill]] %s3585_s1 }
   0x2   :  { %3620 = sst [smem:[#allocation36_spill]] %s3586_s2 }
   0x3   :  { %3621 = sst [smem:[#allocation37_spill]] %s3587_s3 }
   0x4   :  { %3622 = sst [smem:[#allocation38_spill]] %s3591_s7 }
   0x5   :  { %3623 = sst [smem:[#allocation39_spill]] %s3592_s8 }
   0x6   :  { %14 = vsyncpa [#allocation3], 0 }
   0x7   :  { %16 = vsyncpa [#allocation3 + $0x1], 0 }
   0x8   :  { %17 = vsyncpa [#allocation6], 0 }
   0x9   :  { %19 = vsyncpa [#allocation6 + $0x1], 0 }
   0xa   :  { %20 = vsyncpa [#allocation9], 0 }
   0xb   :  { %21 = vsyncpa [#allocation4], 0 }
   0xc   :  { %23 = vsyncpa [#allocation4 + $0x1], 0 }
   0xd   :  { %24 = vsyncpa [#allocation13], 0 }
   0xe   :  { %26 = vsyncpa [#allocation13 + $0x1], 0  ;;  %s2712_s27 = smov 0   ;;  %s2714_s28 = smov 0  }
   0xf   :  { %s2716_s29 = smov 0   ;;  %s2718_s30 = smov 0  }
  0x10   :  { %s2720_s9 = smov 0   ;;  %s2722_s10 = smov 0  }
  0x11 LB: > { %3624 = sst [smem:[#allocation19_spill]] %s2634_s27  ;;  %s2743_s11 = sadd.s32 4294967295, %s2654_s10   ;;  %s2654_s10 = sphi %s2722_s10, %s32_s10   ;;  %s2650_s9 = sphi %s2720_s9, %s3681_s9   ;;  %s2646_s30 = sphi %s2718_s30, %s3680_s30   ;;  %s2642_s29 = sphi %s2716_s29, %s3679_s29   ;;  %s2638_s28 = sphi %s2714_s28, %s3678_s28   ;;  %s2634_s27 = sphi %s2712_s27, %s3677_s27  }
  0x12   : > { %s1625_s12 = sadd.s32 4294967294, %s2654_s10   ;;  %p60_p0 = scmp.ne.s32.totalorder %s2642_s29, %s2638_s28 }
  0x13   : > { %p61_p1 = scmp.eq.s32.totalorder %s2654_s10, 0  ;;  %p66_p2 = scmp.ne.s32.totalorder %s2638_s28, %s2634_s27 }
  0x14   : > { %p3593_p3 = scmp.eq.s32.totalorder %s2743_s11, 0  ;;  %p228_p4 = scmp.eq.s32.totalorder %s2743_s11, 1 }
  0x15   : > { %p2754_p5 = por %p61_p1, %p60_p0  ;;  %p234_p6 = scmp.eq.s32.totalorder %s1625_s12, 1 }
  0x16   : > { %p2760_p7 = por %p3593_p3, %p66_p2  ;;  %p2764_p8 = por %p228_p4, %p60_p0 }
  0x17   : > { %p2768_p9 = por %p234_p6, %p66_p2  ;;  %p1626_p10 = scmp.ge.s32.totalorder %s2654_s10, 1 }
  0x18   : > { %s3627_s16 = scalar_select %p2764_p8, 1, 0 }
  0x19   : > { %s3629_s17 = scalar_select %p2768_p9, 1, 0 }
  0x1a   : > { %3628 = sst [smem:[#allocation20_spill]] %s3627_s16  ;;  %p269_p11 = scmp.lt.s32.totalorder %s2654_s10, 3 }
  0x1b   : > { %3630 = sst [smem:[#allocation21_spill]] %s3629_s17  ;;  %s2656_s19 = smov [#allocation8]  }
  0x1c   : > { %p2774_p12 = pnand %p1626_p10, %p269_p11  ;;  %s281_s20 = sshll.u32 %s2656_s19, 4  ;;  %s282_s20 = int_to_ptr.vmem [resolvable:$true] %s281_s20 }
  0x1d   : > { %s44_s22 = sadd.s32 1, %s2650_s9  ;;  %s2790_s23 = sand.u32 1, %s2642_s29  }
  0x1e   : > { %p2298_p13 = pneg %p2774_p12  ;;  %p2792_p2 = scmp.ge.s32.totalorder %s44_s22, 2 }
  0x1f   : > { %s2411_s25 = scalar_lea.vmem %s282_s20, 2048  ;;  %p2419_p0 = scmp.lt.s32.totalorder %s282_s20, %s282_s20 }
  0x20   : > { %p2784_p4 = pnand %p2298_p13, %p3593_p3  ;;  %p2412_p10 = scmp.ne.s32.totalorder %s282_s20, %s2411_s25 }
  0x21   : > { %p2420_p3 = scmp.lt.s32.totalorder %s2411_s25, %s2411_s25 }
  0x22   : > { %p2402_p6 = pneg %p2784_p4 }
  0x23   : > { %p2421_p1 = por %p2420_p3, %p2419_p0 }
  0x24   : > { %p2414_p11 = pnand %p2412_p10, %p2402_p6 }
  0x26   : > { %p2415_p13 = pneg %p2414_p11 }
  0x28   : > { %p2422_p9 = pnand %p2421_p1, %p2415_p13 }
  0x2a   : > { %2425 = shalt.err (!%p2422_p9)
}
  0x2b   : > { %s3600_s26 = smov 128   ;;  %s3602_s12 = smov 8  }
  0x2c   : > { %s3634_s3 = sld [smem:[#allocation37_spill]]  ;;  %s3683_s22 = smov (%p2792_p2, %s44_s22), 0 }
  0x2d   : > { %3635 = sst [smem:[#allocation22_spill]] %s3683_s22  ;;  %p3636_p3 = scmp.lt.s32.totalorder %s2654_s10, 2 }
  0x2e   : > { %s333_s17 = sand.u32 1, %s2654_s10   ;;  %s48_s27 = ssub.s32 %s2650_s9, %s3683_s22 }
  0x2f   : > { %p2817_p9 = pnand %p3636_p3, %p2754_p5  ;;  %p51_p0 = scmp.eq.s32.totalorder %s48_s27, 0 }
  0x30   : > { %s1632_s7 = sshll.u32 %s2790_s23, 7  ;;  %s1654_s8 = sshll.u32 %s2650_s9, 11 }
  0x31   : > { %s3638_s16 = sadd.s32 1, %s2642_s29  ;;  %s3640_s1 = sld [smem:[#allocation35_spill]] }
  0x32   : > { %2301 = dma.hbm_to_vmem [thread:$0]  (!%p2784_p4), %s3634_s3, 2048, %s282_s20, [#allocation9], %s3600_s26, %s3600_s26, %s3602_s12  }
  0x33   : > { %s2829_s19 = scalar_select %p51_p0, %s2642_s29, %s3638_s16  }
  0x34   : > { %s337_s25 = scalar_lea.vmem [#allocation5], %s1632_s7  ;;  %s2834_s12 = scalar_lea.sflag [#allocation6], %s333_s17 }
  0x35   : > { %3639 = sst [smem:[#allocation23_spill]] %s2829_s19  ;;  %s344_s26 = sshll.u32 %s337_s25, 4  ;;  %s345_s26 = int_to_ptr.vmem [resolvable:$true] %s344_s26 }
  0x36   : > { %p2428_p5 = pneg %p2817_p9  ;;  %s2439_s3 = scalar_lea.vmem %s345_s26, 2048 }
  0x37   : > { %s343_s14 = scalar_lea.hbm %s3640_s1, %s1654_s8  ;;  %p2440_p1 = scmp.ne.s32.totalorder %s345_s26, %s2439_s3 }
  0x38   : > { %s2659_s27 = smov [#allocation5]  }
  0x39   : > { %p2442_p2 = pnand %p2440_p1, %p2428_p5  ;;  %s2444_s16 = sshll.u32 %s2659_s27, 4  ;;  %s2445_s16 = int_to_ptr.vmem [resolvable:$false] %s2444_s16 }
  0x3a   : > { %s2446_s22 = scalar_lea.vmem %s2445_s16, 4096  ;;  %p2447_p11 = scmp.lt.s32.totalorder %s345_s26, %s2445_s16 }
  0x3b   : > { %p2443_p10 = pneg %p2442_p2  ;;  %p2448_p13 = scmp.lt.s32.totalorder %s2446_s22, %s2439_s3 }
  0x3d   : > { %p2449_p3 = por %p2448_p13, %p2447_p11 }
  0x3f   : > { %p2450_p0 = pnand %p2449_p3, %p2443_p10 }
  0x41   : > { %2453 = shalt.err (!%p2450_p0)
}
  0x42   : > { %s3641_s17 = smov 8   ;;  %s3642_s20 = smov 128  }
  0x43   : > { %2311 = dma.hbm_to_vmem [thread:$0]  (!%p2817_p9), %s343_s14, 2048, %s345_s26, %s2834_s12, %s3642_s20, %s3642_s20, %s3641_s17  }
  0x44   : > { %s3643_s2 = sld [smem:[#allocation36_spill]]  ;;  %s358_s27 = scalar_lea.vmem [#allocation7], %s1632_s7 }
  0x45   : > { %s365_s19 = sshll.u32 %s358_s27, 4  ;;  %s2660_s16 = smov [#allocation10]   ;;  %s2868_s19 = int_to_ptr.vmem [resolvable:$true] %s365_s19 }
  0x46   : > { %s294_s3 = sshll.u32 %s2660_s16, 4  ;;  %s295_s3 = int_to_ptr.vmem [resolvable:$true] %s294_s3 }
  0x47   : > { %s2465_s22 = scalar_lea.vmem %s295_s3, 2048  ;;  %p2473_p11 = scmp.lt.s32.totalorder %s295_s3, %s295_s3 }
  0x48   : > { %p2466_p1 = scmp.ne.s32.totalorder %s295_s3, %s2465_s22  ;;  %p2474_p13 = scmp.lt.s32.totalorder %s2465_s22, %s2465_s22 }
  0x4a   : > { %s2850_s1 = scalar_lea.hbm %s3643_s2, %s1654_s8  ;;  %p2468_p2 = pnand %p2466_p1, %p2402_p6 }
  0x4b   : > { %p2475_p3 = por %p2474_p13, %p2473_p11 }
  0x4c   : > { %p2469_p10 = pneg %p2468_p2 }
  0x4e   : > { %p2476_p0 = pnand %p2475_p3, %p2469_p10 }
  0x50   : > { %2479 = shalt.err (!%p2476_p0)
}
  0x51   : > { %2304 = dma.hbm_to_vmem [thread:$0]  (!%p2784_p4), %s3588_s4, 2048, %s295_s3, [#allocation9], %s3642_s20, %s3642_s20, %s3641_s17  }
  0x52   : > { %s1630_s26 = sshll.u32 %s2790_s23, 3  ;;  %s1631_s14 = sshll.u32 %s2650_s9, 7 }
  0x53   : > { %s324_s27 = scalar_lea.hbm %s3584_s0, %s1631_s14  ;;  %s318_s21 = scalar_lea.vmem [#allocation2], %s1630_s26 }
  0x54   : > { %s326_s16 = sshll.u32 %s318_s21, 4  ;;  %s315_s22 = scalar_lea.sflag [#allocation3], %s2790_s23  ;;  %s327_s16 = int_to_ptr.vmem [resolvable:$true] %s326_s16 }
  0x55   : > { %s2493_s2 = scalar_lea.vmem %s327_s16, 128  ;;  %s2661_s7 = smov [#allocation2]  }
  0x56   : > { %p2494_p6 = scmp.ne.s32.totalorder %s327_s16, %s2493_s2  ;;  %s2498_s3 = sshll.u32 %s2661_s7, 4  ;;  %s2499_s3 = int_to_ptr.vmem [resolvable:$false] %s2498_s3 }
  0x57   : > { %s2500_s8 = scalar_lea.vmem %s2499_s3, 256  ;;  %p2501_p4 = scmp.lt.s32.totalorder %s327_s16, %s2499_s3 }
  0x58   : > { %p2496_p1 = pnand %p2494_p6, %p2428_p5  ;;  %p2502_p10 = scmp.lt.s32.totalorder %s2500_s8, %s2493_s2 }
  0x5a   : > { %p2497_p2 = pneg %p2496_p1  ;;  %p2503_p11 = por %p2502_p10, %p2501_p4 }
  0x5c   : > { %p2504_p13 = pnand %p2503_p11, %p2497_p2 }
  0x5e   : > { %2507 = shalt.err (!%p2504_p13)
}
  0x5f   : > { %2308 = dma.hbm_to_vmem [thread:$0]  (!%p2817_p9), %s324_s27, 128, %s327_s16, %s315_s22  }
  0x60   : > { %s2521_s23 = scalar_lea.vmem %s2868_s19, 2048  ;;  %s2662_s26 = smov [#allocation7]  }
  0x61   : > { %p2522_p3 = scmp.ne.s32.totalorder %s2868_s19, %s2521_s23  ;;  %s2526_s14 = sshll.u32 %s2662_s26, 4  ;;  %s2527_s14 = int_to_ptr.vmem [resolvable:$false] %s2526_s14 }
  0x62   : > { %s2528_s2 = scalar_lea.vmem %s2527_s14, 4096  ;;  %p2529_p1 = scmp.lt.s32.totalorder %s2868_s19, %s2527_s14 }
  0x63   : > { %p2524_p0 = pnand %p2522_p3, %p2428_p5  ;;  %p2530_p2 = scmp.lt.s32.totalorder %s2528_s2, %s2521_s23 }
  0x65   : > { %p2525_p6 = pneg %p2524_p0  ;;  %p2531_p4 = por %p2530_p2, %p2529_p1 }
  0x67   : > { %p2532_p10 = pnand %p2531_p4, %p2525_p6 }
  0x69   : > { %2535 = shalt.err (!%p2532_p10)
}
  0x6a   : > { %2314 = dma.hbm_to_vmem [thread:$0]  (!%p2817_p9), %s2850_s1, 2048, %s2868_s19, %s2834_s12, %s3642_s20, %s3642_s20, %s3641_s17  }
  0x6b   : > { %377 = sbr.rel (%p2774_p12) target bundleno = 2440 (0x988), region = 48 }
  0x70   : > { %s2893_s24 = sand.u32 1, %s2638_s28  }
  0x71   : > { %s2896_s25 = sshll.u32 %s2893_s24, 3  ;;  %s380_s13 = scalar_lea.sflag [#allocation3], %s2893_s24 }
  0x72   : > { %s383_s27 = scalar_lea.vmem [#allocation2], %s2896_s25 }
  0x73   : > { %2613 = dma.done.wait (%p2760_p7), %s380_s13, 128  }
  0x74   : > { %2615 = vsyncadd (%p2760_p7), %s380_s13, 4294967168  ;;  %s388_s1 = sand.u32 1, %s2743_s11   ;;  %s1640_s18 = sshll.u32 %s2893_s24, 7 }
  0x75   : > { %s389_s12 = scalar_lea.sflag [#allocation6], %s388_s1  ;;  %s2906_s19 = scalar_lea.vmem [#allocation5], %s1640_s18 }
  0x76   : > { %2617 = dma.done.wait (%p2760_p7), %s389_s12, 4096  }
  0x77   : > { %2619 = vsyncadd (%p2760_p7), %s389_s12, 4294963200  ;;  %s2912_s17 = scalar_lea.vmem [#allocation7], %s1640_s18  ;;  %p3644_p12 = scmp.eq.s32.totalorder %s2743_s11, 0 }
  0x79   : > { %2621 = dma.done.wait (%p3644_p12), [#allocation9], 4096   ;;  %p3645_p9 = pmov %p3644_p12 }
  0x7a   : > { %v2663_v0 = vmov 0.0   ;;  %vm2664_vm0 = vmmov 0   ;;  %v2925_v1 = vld [vmem:[%s2906_s19 + $0x78] sm:$0xff]  ;;  %v2928_v2 = vld [vmem:[%s2906_s19 + $0x70] sm:$0xff]  ;;  %v2933_v3 = vld [vmem:[%s2906_s19 + $0x68] sm:$0xff]  ;;  %s456_s22 = scalar_lea.vmem [#allocation12], %s2896_s25 }
  0x7b   : > { %2623 = vsyncadd (%p3645_p9), [#allocation9], 4294963200  ;;  %1860 = vmatprep.subr.mxu0 %v2663_v0  ;;  %1892 = vmatprep.mubr.msk.f32.mxu0 %vm2664_vm0, %v2663_v0  ;;  %v2938_v4 = vld [vmem:[%s2906_s19 + $0x60] sm:$0xff]  ;;  %v2943_v5 = vld [vmem:[%s2906_s19 + $0x58] sm:$0xff]  ;;  %s1650_s7 = sshll.u32 %s2646_s30, 7  ;;  %s3669_s23 = sld [smem:[#allocation39_spill]] }
  0x7c   : > { %1895 = vmatprep.subr.mxu1 %v2663_v0  ;;  %1927 = vmatprep.mubr.msk.f32.mxu1 %vm2664_vm0, %v2663_v0  ;;  %v2948_v6 = vld [vmem:[%s2906_s19 + $0x50] sm:$0xff]  ;;  %v2953_v7 = vld [vmem:[%s2906_s19 + $0x48] sm:$0xff]  ;;  %v2958_v8 = vld [vmem:[%s2906_s19 + $0x40] sm:$0xff]  ;;  %s1449_s14 = sshll.u32 %s456_s22, 4  ;;  %s1421_s2 = scalar_lea.sflag [#allocation13], %s2893_s24  ;;  %s1450_s14 = int_to_ptr.vmem [resolvable:$true] %s1449_s14 }
  0x7d   : > { %1861 = vmatpush3.msra.mxu0 %v2925_v1  ;;  %v2963_v9 = vld [vmem:[%s2906_s19 + $0x38] sm:$0xff]  ;;  %v2968_v10 = vld [vmem:[%s2906_s19 + $0x30] sm:$0xff]  ;;  %v2973_v11 = vld [vmem:[%s2906_s19 + $0x28] sm:$0xff]  ;;  %s2536_s13 = scalar_lea.vmem %s1450_s14, 128 }
  0x7e   : > { %1862 = vmatprep.subr.mxu0 %v2663_v0  ;;  %v2978_v12 = vld [vmem:[%s2906_s19 + $0x20] sm:$0xff]  ;;  %v2983_v13 = vld [vmem:[%s2906_s19 + $0x18] sm:$0xff]  ;;  %v2988_v14 = vld [vmem:[%s2906_s19 + $0x10] sm:$0xff]  ;;  %p2537_p7 = scmp.ne.s32.totalorder %s1450_s14, %s2536_s13 }
  0x7f   : > { %1863 = vmatpush3.msra.mxu0 %v2928_v2  ;;  %3646 = vst [vmem:[#allocation24_spill] sm:$0xff] %v2983_v13  ;;  %3647 = vst [vmem:[#allocation25_spill] sm:$0xff] %v2988_v14  ;;  %v2993_v15 = vld [vmem:[%s2906_s19 + $0x8] sm:$0xff]  ;;  %v2998_v16 = vld [vmem:[%s2906_s19] sm:$0xff] }
  0x80   : > { %1864 = vmatprep.subr.mxu0 %v2663_v0  ;;  %3648 = vst [vmem:[#allocation26_spill] sm:$0xff] %v2993_v15  ;;  %v3003_v17 = vld [vmem:[%s383_s27] sm:$0xff]  ;;  %v3020_v20 = vld [vmem:[%s2912_s17 + $0x68] sm:$0xff]  ;;  %v3025_v21 = vld [vmem:[%s2912_s17 + $0x60] sm:$0xff]  ;;  %p2538_p5 = pnand %p2537_p7, %p2764_p8  ;;  %s2665_s27 = smov [#allocation12]  }
  0x81   : > { %1865 = vmatpush3.msra.mxu0 %v2933_v3  ;;  %v3012_v18 = vld [vmem:[%s2912_s17 + $0x78] sm:$0xff]  ;;  %v3015_v19 = vld [vmem:[%s2912_s17 + $0x70] sm:$0xff]  ;;  %v3040_v24 = vld [vmem:[%s2912_s17 + $0x48] sm:$0xff]  ;;  %s1447_s26 = scalar_lea.hbm %s3669_s23, %s1650_s7  ;;  %s2540_s1 = sshll.u32 %s2665_s27, 4  ;;  %s2541_s1 = int_to_ptr.vmem [resolvable:$false] %s2540_s1 }
  0x82   : > { %1866 = vmatprep.subr.mxu0 %v2663_v0  ;;  %1896 = vmatpush3.msra.mxu1 %v3012_v18  ;;  %v3030_v22 = vld [vmem:[%s2912_s17 + $0x58] sm:$0xff]  ;;  %v3035_v23 = vld [vmem:[%s2912_s17 + $0x50] sm:$0xff]  ;;  %v3053_v29 = vld [vmem:[%s2912_s17 + $0x40] sm:$0xff]  ;;  %p2539_p11 = pneg %p2538_p5  ;;  %s2542_s18 = scalar_lea.vmem %s2541_s1, 256 }
  0x83   : > { %1867 = vmatpush3.msra.mxu0 %v2938_v4  ;;  %1897 = vmatprep.subr.mxu1 %v2663_v0  ;;  %v3049_v25 = vld [vmem:[%s3590_s6] ss:$0 sm:$0xff]  ;;  %v3058_v30 = vld [vmem:[%s2912_s17 + $0x38] sm:$0xff]  ;;  %v3066_v32 = vld [vmem:[%s2912_s17 + $0x28] sm:$0xff]  ;;  %p2543_p13 = scmp.lt.s32.totalorder %s1450_s14, %s2541_s1  ;;  %p2544_p3 = scmp.lt.s32.totalorder %s2542_s18, %s2536_s13 }
  0x84   : > { %1868 = vmatprep.subr.mxu0 %v2663_v0  ;;  %1898 = vmatpush3.msra.mxu1 %v3015_v19  ;;  %v3063_v31 = vld [vmem:[%s2912_s17 + $0x30] sm:$0xff]  ;;  %3650 = vst [vmem:[#allocation28_spill] sm:$0xff] %v3066_v32  ;;  %v3071_v33 = vld [vmem:[%s2912_s17 + $0x20] sm:$0xff]  ;;  %v3076_v34 = vld [vmem:[%s2912_s17 + $0x18] sm:$0xff] }
  0x85   : > { %1869 = vmatpush3.msra.mxu0 %v2943_v5  ;;  %1899 = vmatprep.subr.mxu1 %v2663_v0  ;;  %3649 = vst [vmem:[#allocation27_spill] sm:$0xff] %v3063_v31  ;;  %3651 = vst [vmem:[#allocation29_spill] sm:$0xff] %v3071_v33  ;;  %v3081_v35 = vld [vmem:[%s2912_s17 + $0x10] sm:$0xff]  ;;  %v3086_v36 = vld [vmem:[%s2912_s17 + $0x8] sm:$0xff]  ;;  %p2545_p0 = por %p2544_p3, %p2543_p13 }
  0x86   : > { %1870 = vmatprep.subr.mxu0 %v2663_v0  ;;  %1900 = vmatpush3.msra.mxu1 %v3020_v20  ;;  %3652 = vst [vmem:[#allocation30_spill] sm:$0xff] %v3076_v34  ;;  %v3091_v37 = vld [vmem:[%s2912_s17] sm:$0xff]  ;;  %v3099_v42 = vld [vmem:[#allocation8 + $0x78] sm:$0xff]  ;;  %v3103_v44 = vld [vmem:[#allocation8 + $0x70] sm:$0xff] }
  0x87   : > { %1871 = vmatpush3.msra.mxu0 %v2948_v6  ;;  %1901 = vmatprep.subr.mxu1 %v2663_v0  ;;  %v3101_v43 = vld [vmem:[#allocation10 + $0x78] sm:$0xff]  ;;  %v3107_v45 = vld [vmem:[#allocation10 + $0x70] sm:$0xff]  ;;  %v3111_v46 = vld [vmem:[#allocation8 + $0x68] sm:$0xff]  ;;  %p2546_p6 = pnand %p2545_p0, %p2539_p11 }
  0x88   : > { %1872 = vmatprep.subr.mxu0 %v2663_v0  ;;  %1902 = vmatpush3.msra.mxu1 %v3025_v21  ;;  %v3113_v47 = vld [vmem:[#allocation10 + $0x68] sm:$0xff]  ;;  %v3119_v48 = vld [vmem:[#allocation8 + $0x60] sm:$0xff]  ;;  %v3127_v50 = vld [vmem:[#allocation8 + $0x58] sm:$0xff] }
  0x89   : > { %1873 = vmatpush3.msra.mxu0 %v2953_v7  ;;  %1903 = vmatprep.subr.mxu1 %v2663_v0  ;;  %v3121_v49 = vld [vmem:[#allocation10 + $0x60] sm:$0xff]  ;;  %v3129_v51 = vld [vmem:[#allocation10 + $0x58] sm:$0xff]  ;;  %v3135_v52 = vld [vmem:[#allocation8 + $0x50] sm:$0xff] }
  0x8a   : > { %1874 = vmatprep.subr.mxu0 %v2663_v0  ;;  %1904 = vmatpush3.msra.mxu1 %v3030_v22  ;;  %v3137_v53 = vld [vmem:[#allocation10 + $0x50] sm:$0xff]  ;;  %v3143_v54 = vld [vmem:[#allocation8 + $0x48] sm:$0xff]  ;;  %v3151_v56 = vld [vmem:[#allocation8 + $0x40] sm:$0xff] }
  0x8b   : > { %1875 = vmatpush3.msra.mxu0 %v2958_v8  ;;  %1905 = vmatprep.subr.mxu1 %v2663_v0  ;;  %v3145_v55 = vld [vmem:[#allocation10 + $0x48] sm:$0xff]  ;;  %v3153_v57 = vld [vmem:[#allocation10 + $0x40] sm:$0xff]  ;;  %v3159_v58 = vld [vmem:[#allocation8 + $0x38] sm:$0xff] }
  0x8c   : > { %1876 = vmatprep.subr.mxu0 %v2663_v0  ;;  %1906 = vmatpush3.msra.mxu1 %v3035_v23  ;;  %v3161_v59 = vld [vmem:[#allocation10 + $0x38] sm:$0xff]  ;;  %v3167_v60 = vld [vmem:[#allocation8 + $0x30] sm:$0xff]  ;;  %v3175_v62 = vld [vmem:[#allocation8 + $0x28] sm:$0xff] }
  0x8d   : > { %1877 = vmatpush3.msra.mxu0 %v2963_v9  ;;  %1907 = vmatprep.subr.mxu1 %v2663_v0  ;;  %v3169_v61 = vld [vmem:[#allocation10 + $0x30] sm:$0xff]  ;;  %v3177_v63 = vld [vmem:[#allocation10 + $0x28] sm:$0xff] }
  0x8e   : > { %1878 = vmatprep.subr.mxu0 %v2663_v0  ;;  %1908 = vmatpush3.msra.mxu1 %v3040_v24 }
  0x8f   : > { %1879 = vmatpush3.msra.mxu0 %v2968_v10  ;;  %1909 = vmatprep.subr.mxu1 %v2663_v0 }
  0x90   : > { %1880 = vmatprep.subr.mxu0 %v2663_v0  ;;  %1910 = vmatpush3.msra.mxu1 %v3053_v29 }
  0x91   : > { %1881 = vmatpush3.msra.mxu0 %v2973_v11  ;;  %1911 = vmatprep.subr.mxu1 %v2663_v0 }
  0x92   : > { %1882 = vmatprep.subr.mxu0 %v2663_v0  ;;  %1912 = vmatpush3.msra.mxu1 %v3058_v30 }
  0x93   : > { %1883 = vmatpush3.msra.mxu0 %v2978_v12  ;;  %1913 = vmatprep.subr.mxu1 %v2663_v0 }
  0x94   : > { %1884 = vmatprep.subr.mxu0 %v2663_v0  ;;  %1914 = vmatpush3.msra.mxu1 %v3063_v31 }
  0x95   : > { %1885 = vmatpush3.msra.mxu0 %v2983_v13  ;;  %1915 = vmatprep.subr.mxu1 %v2663_v0 }
  0x96   : > { %1886 = vmatprep.subr.mxu0 %v2663_v0  ;;  %1916 = vmatpush3.msra.mxu1 %v3066_v32 }
  0x97   : > { %1887 = vmatpush3.msra.mxu0 %v2988_v14  ;;  %1917 = vmatprep.subr.mxu1 %v2663_v0 }
  0x98   : > { %1888 = vmatprep.subr.mxu0 %v2663_v0  ;;  %1918 = vmatpush3.msra.mxu1 %v3071_v33 }
  0x99   : > { %1889 = vmatpush3.msra.mxu0 %v2993_v15  ;;  %1919 = vmatprep.subr.mxu1 %v2663_v0 }
  0x9a   : > { %1890 = vmatprep.subr.mxu0 %v2663_v0  ;;  %1920 = vmatpush3.msra.mxu1 %v3076_v34 }
  0x9b   : > { %1891 = vmatpush3.msra.mxu0 %v2998_v16  ;;  %1921 = vmatprep.subr.mxu1 %v2663_v0 }
  0x9c   : > { %1893 = vmatmul.mubr.f32.vlgmr.msra.gmra.mxu0 %v3003_v17  ;;  %1930 = vmatprep.subr.mxu0 %v2663_v0 }
  0x9d   : > { %1962 = vmatprep.mubr.msk.f32.mxu0 %vm2664_vm0, %v2663_v0  ;;  %1922 = vmatpush3.msra.mxu1 %v3081_v35 }
  0x9e   : > { %1923 = vmatprep.subr.mxu1 %v2663_v0  ;;  %1931 = vmatpush3.msra.mxu0 %v3101_v43 }
  0x9f   : > { %1924 = vmatpush3.msra.mxu1 %v3086_v36  ;;  %1932 = vmatprep.subr.mxu0 %v2663_v0 }
  0xa0   : > { %1925 = vmatprep.subr.mxu1 %v2663_v0  ;;  %1933 = vmatpush3.msra.mxu0 %v3107_v45 }
  0xa1   : > { %1926 = vmatpush3.msra.mxu1 %v3091_v37  ;;  %1934 = vmatprep.subr.mxu0 %v2663_v0 }
  0xa2   : > { %1965 = vmatprep.subr.mxu1 %v2663_v0  ;;  %1935 = vmatpush3.msra.mxu0 %v3113_v47 }
  0xa3   : > { %1936 = vmatprep.subr.mxu0 %v2663_v0 }
  0xa4   : > { %1937 = vmatpush3.msra.mxu0 %v3121_v49 }
  0xa5   : > { %1938 = vmatprep.subr.mxu0 %v2663_v0 }
  0xa6   : > { %1939 = vmatpush3.msra.mxu0 %v3129_v51 }
  0xa7   : > { %1940 = vmatprep.subr.mxu0 %v2663_v0 }
  0xa8   : > { %1941 = vmatpush3.msra.mxu0 %v3137_v53 }
  0xa9   : > { %1942 = vmatprep.subr.mxu0 %v2663_v0 }
  0xaa   : > { %1943 = vmatpush3.msra.mxu0 %v3145_v55 }
  0xab   : > { %1944 = vmatprep.subr.mxu0 %v2663_v0 }
  0xac   : > { %1945 = vmatpush3.msra.mxu0 %v3153_v57 }
  0xad   : > { %1946 = vmatprep.subr.mxu0 %v2663_v0 }
  0xae   : > { %1947 = vmatpush3.msra.mxu0 %v3161_v59 }
  0xaf   : > { %1948 = vmatprep.subr.mxu0 %v2663_v0 }
  0xb0   : > { %1949 = vmatpush3.msra.mxu0 %v3169_v61 }
  0xb1   : > { %1950 = vmatprep.subr.mxu0 %v2663_v0 }
  0xb2   : > { %1951 = vmatpush3.msra.mxu0 %v3177_v63 }
  0xb3   : > { %1952 = vmatprep.subr.mxu0 %v2663_v0 }
 0x15c   : > { %v596_v26 = vpop.f32.mrf.mxu0 }
 0x15d   : > { %v597_v27 = vadd.f32 %v3049_v25, %v596_v26  ;;  %v3183_v26 = vld [vmem:[#allocation8 + $0x20] sm:$0xff] }
 0x15e   : > { %v1894_v28 = vpop.f32.mrf.mxu0  ;;  %3653 = vst [vmem:[#allocation31_spill] sm:$0xff] %v3183_v26 }
 0x15f   : > { %600 = vmax.xlane.f32.xlu0 %v597_v27  ;;  %v3191_v28 = vld [vmem:[#allocation8 + $0x18] sm:$0xff] }
 0x160   : > { %3654 = vst [vmem:[#allocation32_spill] sm:$0xff] %v3191_v28 }
 0x1e8   : > { %v601_v38 = vpop.xlane.xlu0 %600 }
 0x1e9   : > { %v602_v39 = vsub.f32 %v597_v27, %v601_v38  ;;  %v3185_v27 = vld [vmem:[#allocation10 + $0x20] sm:$0xff]  ;;  %v3193_v38 = vld [vmem:[#allocation10 + $0x18] sm:$0xff] }
 0x1ea   : > { %1953 = vmatpush3.msra.mxu0 %v3185_v27 }
 0x1eb   : > { %v603_v40 = vmul.f32 1.442695, %v602_v39  ;;  %1954 = vmatprep.subr.mxu0 %v2663_v0  ;;  %v3199_v39 = vld [vmem:[#allocation8 + $0x10] sm:$0xff] }
 0x1ec   : > { %3655 = vst [vmem:[#allocation33_spill] sm:$0xff] %v3199_v39  ;;  %1955 = vmatpush3.msra.mxu0 %v3193_v38 }
 0x1ed   : > { %2382 = vpow2.f32 %v603_v40  ;;  %v3201_v40 = vld [vmem:[#allocation10 + $0x10] sm:$0xff]  ;;  %1956 = vmatprep.subr.mxu0 %v2663_v0 }
 0x1ee   : > { %3656 = vst [vmem:[#allocation34_spill] sm:$0xff] %v3201_v40  ;;  %1957 = vmatpush3.msra.mxu0 %v3201_v40 }
 0x1ef   : > { %1958 = vmatprep.subr.mxu0 %v2663_v0 }
 0x1fa   : > { %v2383_v41 = vpop.eup %2382 }
 0x1fb   : > { %605 = vadd.xlane.f32.xlu0 %v2383_v41  ;;  %1928 = vmatmul.mubr.f32.vlgmr.msra.gmra.mxu1 %v2383_v41  ;;  %v3207_v41 = vld [vmem:[#allocation8 + $0x8] sm:$0xff] }
 0x1fc   : > { %1997 = vmatprep.mubr.msk.f32.mxu1 %vm2664_vm0, %v2663_v0  ;;  %1966 = vmatpush3.msra.mxu1 %v3099_v42 }
 0x1fd   : > { %1967 = vmatprep.subr.mxu1 %v2663_v0 }
 0x1fe   : > { %1968 = vmatpush3.msra.mxu1 %v3103_v44 }
 0x1ff   : > { %1969 = vmatprep.subr.mxu1 %v2663_v0 }
 0x200   : > { %1970 = vmatpush3.msra.mxu1 %v3111_v46 }
 0x201   : > { %1971 = vmatprep.subr.mxu1 %v2663_v0 }
 0x202   : > { %1972 = vmatpush3.msra.mxu1 %v3119_v48 }
 0x203   : > { %1973 = vmatprep.subr.mxu1 %v2663_v0 }
 0x204   : > { %1974 = vmatpush3.msra.mxu1 %v3127_v50 }
 0x205   : > { %1975 = vmatprep.subr.mxu1 %v2663_v0 }
 0x206   : > { %1976 = vmatpush3.msra.mxu1 %v3135_v52 }
 0x207   : > { %1977 = vmatprep.subr.mxu1 %v2663_v0 }
 0x208   : > { %1978 = vmatpush3.msra.mxu1 %v3143_v54 }
 0x209   : > { %1979 = vmatprep.subr.mxu1 %v2663_v0 }
 0x20a   : > { %1980 = vmatpush3.msra.mxu1 %v3151_v56 }
 0x20b   : > { %1981 = vmatprep.subr.mxu1 %v2663_v0 }
 0x20c   : > { %1982 = vmatpush3.msra.mxu1 %v3159_v58 }
 0x20d   : > { %1983 = vmatprep.subr.mxu1 %v2663_v0 }
 0x20e   : > { %1984 = vmatpush3.msra.mxu1 %v3167_v60 }
 0x20f   : > { %1985 = vmatprep.subr.mxu1 %v2663_v0 }
 0x210   : > { %1986 = vmatpush3.msra.mxu1 %v3175_v62 }
 0x211   : > { %1987 = vmatprep.subr.mxu1 %v2663_v0 }
 0x212   : > { %1988 = vmatpush3.msra.mxu1 %v3183_v26  ;;  %v3217_v26 = vld [vmem:[#allocation8] sm:$0xff] }
 0x213   : > { %1989 = vmatprep.subr.mxu1 %v2663_v0 }
 0x214   : > { %1990 = vmatpush3.msra.mxu1 %v3191_v28  ;;  %v3215_v28 = vld [vmem:[#allocation10 + $0x8] sm:$0xff] }
 0x215   : > { %1991 = vmatprep.subr.mxu1 %v2663_v0  ;;  %1959 = vmatpush3.msra.mxu0 %v3215_v28 }
 0x216   : > { %1992 = vmatpush3.msra.mxu1 %v3199_v39  ;;  %1960 = vmatprep.subr.mxu0 %v2663_v0  ;;  %v3223_v39 = vld [vmem:[#allocation10] sm:$0xff] }
 0x217   : > { %1993 = vmatprep.subr.mxu1 %v2663_v0  ;;  %1961 = vmatpush3.msra.mxu0 %v3223_v39 }
 0x218   : > { %1994 = vmatpush3.msra.mxu1 %v3207_v41  ;;  %2000 = vmatprep.subr.mxu0 %v2663_v0 }
 0x219   : > { %1995 = vmatprep.subr.mxu1 %v2663_v0 }
 0x21a   : > { %1996 = vmatpush3.msra.mxu1 %v3217_v26 }
 0x21b   : > { %1998 = vmatmul.mubr.f32.vlgmr.msra.gmra.mxu1 %v3003_v17  ;;  %2035 = vmatprep.subr.mxu1 %v2663_v0 }
 0x21c   : > { %2036 = vmatpush3.msra.mxu1 %v3012_v18  ;;  %2067 = vmatprep.mubr.msk.f32.mxu1 %vm2664_vm0, %v2663_v0 }
 0x21d   : > { %2037 = vmatprep.subr.mxu1 %v2663_v0 }
 0x21e   : > { %2038 = vmatpush3.msra.mxu1 %v3015_v19 }
 0x21f   : > { %2039 = vmatprep.subr.mxu1 %v2663_v0 }
 0x220   : > { %2040 = vmatpush3.msra.mxu1 %v3020_v20 }
 0x221   : > { %2041 = vmatprep.subr.mxu1 %v2663_v0 }
 0x222   : > { %2042 = vmatpush3.msra.mxu1 %v3025_v21 }
 0x223   : > { %2043 = vmatprep.subr.mxu1 %v2663_v0 }
 0x224   : > { %2044 = vmatpush3.msra.mxu1 %v3030_v22 }
 0x225   : > { %2045 = vmatprep.subr.mxu1 %v2663_v0 }
 0x226   : > { %2046 = vmatpush3.msra.mxu1 %v3035_v23 }
 0x227   : > { %2047 = vmatprep.subr.mxu1 %v2663_v0 }
 0x228   : > { %2048 = vmatpush3.msra.mxu1 %v3040_v24 }
 0x229   : > { %2049 = vmatprep.subr.mxu1 %v2663_v0 }
 0x22a   : > { %2050 = vmatpush3.msra.mxu1 %v3053_v29 }
 0x22b   : > { %2051 = vmatprep.subr.mxu1 %v2663_v0 }
 0x22c   : > { %2052 = vmatpush3.msra.mxu1 %v3058_v30 }
 0x22d   : > { %2053 = vmatprep.subr.mxu1 %v2663_v0 }
 0x22e   : > { %2054 = vmatpush3.msra.mxu1 %v3063_v31 }
 0x22f   : > { %2055 = vmatprep.subr.mxu1 %v2663_v0 }
 0x230   : > { %2056 = vmatpush3.msra.mxu1 %v3066_v32 }
 0x231   : > { %2057 = vmatprep.subr.mxu1 %v2663_v0 }
 0x232   : > { %2058 = vmatpush3.msra.mxu1 %v3071_v33 }
 0x233   : > { %2059 = vmatprep.subr.mxu1 %v2663_v0 }
 0x234   : > { %2060 = vmatpush3.msra.mxu1 %v3076_v34 }
 0x235   : > { %2061 = vmatprep.subr.mxu1 %v2663_v0 }
 0x236   : > { %2062 = vmatpush3.msra.mxu1 %v3081_v35 }
 0x237   : > { %2063 = vmatprep.subr.mxu1 %v2663_v0 }
 0x238   : > { %2064 = vmatpush3.msra.mxu1 %v3086_v36 }
 0x239   : > { %2065 = vmatprep.subr.mxu1 %v2663_v0 }
 0x23a   : > { %2066 = vmatpush3.msra.mxu1 %v3091_v37 }
 0x23b   : > { %2105 = vmatprep.subr.mxu1 %v2663_v0 }
 0x284   : > { %v606_v17 = vpop.xlane.xlu0 %605 }
 0x285   : > { %2384 = vrcp.f32 %v606_v17 }
 0x292   : > { %v2385_v33 = vpop.eup %2384 }
 0x2bb   : > { %v675_v32 = vpop.f32.mrf.mxu1 }
 0x2bc   : > { %v679_v31 = vmul.f32 %v2385_v33, %v675_v32  ;;  %v3299_v33 = vld [vmem:[%s3589_s5] ss:$0 sm:$0xff] }
 0x2bd   : > { %v1929_v34 = vpop.f32.mrf.mxu1 }
 0x2be   : > { %1963 = vmatmul.mubr.f32.vlgmr.msra.gmra.mxu0 %v679_v31 }
 0x2bf   : > { %2001 = vmatpush3.msra.mxu0 %v2925_v1  ;;  %2032 = vmatprep.mubr.msk.f32.mxu0 %vm2664_vm0, %v2663_v0 }
 0x2c0   : > { %2002 = vmatprep.subr.mxu0 %v2663_v0 }
 0x2c1   : > { %2003 = vmatpush3.msra.mxu0 %v2928_v2 }
 0x2c2   : > { %2004 = vmatprep.subr.mxu0 %v2663_v0 }
 0x2c3   : > { %2005 = vmatpush3.msra.mxu0 %v2933_v3 }
 0x2c4   : > { %2006 = vmatprep.subr.mxu0 %v2663_v0 }
 0x2c5   : > { %2007 = vmatpush3.msra.mxu0 %v2938_v4 }
 0x2c6   : > { %2008 = vmatprep.subr.mxu0 %v2663_v0 }
 0x2c7   : > { %2009 = vmatpush3.msra.mxu0 %v2943_v5 }
 0x2c8   : > { %2010 = vmatprep.subr.mxu0 %v2663_v0 }
 0x2c9   : > { %2011 = vmatpush3.msra.mxu0 %v2948_v6 }
 0x2ca   : > { %2012 = vmatprep.subr.mxu0 %v2663_v0 }
 0x2cb   : > { %2013 = vmatpush3.msra.mxu0 %v2953_v7 }
 0x2cc   : > { %2014 = vmatprep.subr.mxu0 %v2663_v0 }
 0x2cd   : > { %2015 = vmatpush3.msra.mxu0 %v2958_v8 }
 0x2ce   : > { %2016 = vmatprep.subr.mxu0 %v2663_v0 }
 0x2cf   : > { %2017 = vmatpush3.msra.mxu0 %v2963_v9 }
 0x2d0   : > { %2018 = vmatprep.subr.mxu0 %v2663_v0 }
 0x2d1   : > { %2019 = vmatpush3.msra.mxu0 %v2968_v10 }
 0x2d2   : > { %2020 = vmatprep.subr.mxu0 %v2663_v0 }
 0x2d3   : > { %2021 = vmatpush3.msra.mxu0 %v2973_v11 }
 0x2d4   : > { %2022 = vmatprep.subr.mxu0 %v2663_v0 }
 0x2d5   : > { %2023 = vmatpush3.msra.mxu0 %v2978_v12 }
 0x2d6   : > { %2024 = vmatprep.subr.mxu0 %v2663_v0 }
 0x2d7   : > { %2025 = vmatpush3.msra.mxu0 %v2983_v13 }
 0x2d8   : > { %2026 = vmatprep.subr.mxu0 %v2663_v0 }
 0x2d9   : > { %2027 = vmatpush3.msra.mxu0 %v2988_v14 }
 0x2da   : > { %2028 = vmatprep.subr.mxu0 %v2663_v0 }
 0x2db   : > { %2029 = vmatpush3.msra.mxu0 %v2993_v15  ;;  %v816_v31 = vpop.f32.mrf.mxu1 }
 0x2dc   : > { %2030 = vmatprep.subr.mxu0 %v2663_v0 }
 0x2dd   : > { %2031 = vmatpush3.msra.mxu0 %v2998_v16  ;;  %v1999_v32 = vpop.f32.mrf.mxu1 }
 0x2de   : > { %2070 = vmatprep.subr.mxu0 %v2663_v0 }
 0x37e   : > { %v746_v34 = vpop.f32.mrf.mxu0 }
 0x37f   : > { %v817_v17 = vadd.f32 %v816_v31, %v746_v34 }
 0x380   : > { %v1964_v14 = vpop.f32.mrf.mxu0 }
 0x381   : > { %v826_v13 = vadd.f32 %v3299_v33, %v817_v17 }
 0x383   : > { %2386 = vtanh.f32 %v826_v13 }
 0x390   : > { %v3302_v15 = vpop.eup %2386 }
 0x391   : > { %2033 = vmatmul.mubr.f32.vlgmr.msra.gmra.mxu0 %v3302_v15 }
 0x392   : > { %2071 = vmatpush3.msra.mxu0 %v3101_v43  ;;  %2102 = vmatprep.mubr.msk.f32.mxu0 %vm2664_vm0, %v2663_v0 }
 0x393   : > { %2072 = vmatprep.subr.mxu0 %v2663_v0 }
 0x394   : > { %2073 = vmatpush3.msra.mxu0 %v3107_v45 }
 0x395   : > { %2074 = vmatprep.subr.mxu0 %v2663_v0 }
 0x396   : > { %2075 = vmatpush3.msra.mxu0 %v3113_v47 }
 0x397   : > { %2076 = vmatprep.subr.mxu0 %v2663_v0 }
 0x398   : > { %2077 = vmatpush3.msra.mxu0 %v3121_v49 }
 0x399   : > { %2078 = vmatprep.subr.mxu0 %v2663_v0 }
 0x39a   : > { %2079 = vmatpush3.msra.mxu0 %v3129_v51 }
 0x39b   : > { %2080 = vmatprep.subr.mxu0 %v2663_v0 }
 0x39c   : > { %2081 = vmatpush3.msra.mxu0 %v3137_v53 }
 0x39d   : > { %2082 = vmatprep.subr.mxu0 %v2663_v0 }
 0x39e   : > { %2083 = vmatpush3.msra.mxu0 %v3145_v55 }
 0x39f   : > { %2084 = vmatprep.subr.mxu0 %v2663_v0 }
 0x3a0   : > { %2085 = vmatpush3.msra.mxu0 %v3153_v57 }
 0x3a1   : > { %2086 = vmatprep.subr.mxu0 %v2663_v0 }
 0x3a2   : > { %2087 = vmatpush3.msra.mxu0 %v3161_v59 }
 0x3a3   : > { %2088 = vmatprep.subr.mxu0 %v2663_v0 }
 0x3a4   : > { %2089 = vmatpush3.msra.mxu0 %v3169_v61 }
 0x3a5   : > { %2090 = vmatprep.subr.mxu0 %v2663_v0 }
 0x3a6   : > { %2091 = vmatpush3.msra.mxu0 %v3177_v63 }
 0x3a7   : > { %2092 = vmatprep.subr.mxu0 %v2663_v0 }
 0x3a8   : > { %2093 = vmatpush3.msra.mxu0 %v3185_v27 }
 0x3a9   : > { %2094 = vmatprep.subr.mxu0 %v2663_v0 }
 0x3aa   : > { %2095 = vmatpush3.msra.mxu0 %v3193_v38 }
 0x3ab   : > { %2096 = vmatprep.subr.mxu0 %v2663_v0 }
 0x3ac   : > { %2097 = vmatpush3.msra.mxu0 %v3201_v40 }
 0x3ad   : > { %2098 = vmatprep.subr.mxu0 %v2663_v0 }
 0x3ae   : > { %2099 = vmatpush3.msra.mxu0 %v3215_v28 }
 0x3af   : > { %2100 = vmatprep.subr.mxu0 %v2663_v0 }
 0x3b0   : > { %2101 = vmatpush3.msra.mxu0 %v3223_v39 }
 0x3b1   : > { %2140 = vmatprep.subr.mxu0 %v2663_v0 }
 0x451   : > { %v894_v13 = vpop.f32.mrf.mxu0 }
 0x452   : > { %v895_v14 = vadd.f32 %v3049_v25, %v894_v13  ;;  %v3658_v13 = vld [vmem:[#allocation32_spill] sm:$0xff] }
 0x453   : > { %v2034_v31 = vpop.f32.mrf.mxu0 }
 0x454   : > { %898 = vmax.xlane.f32.xlu1 %v895_v14 }
 0x4dd   : > { %v899_v32 = vpop.xlane.xlu1 %898 }
 0x4de   : > { %v900_v34 = vsub.f32 %v895_v14, %v899_v32  ;;  %v3659_v14 = vld [vmem:[#allocation33_spill] sm:$0xff] }
 0x4e0   : > { %v901_v17 = vmul.f32 1.442695, %v900_v34 }
 0x4e2   : > { %2388 = vpow2.f32 %v901_v17 }
 0x4ef   : > { %v2389_v40 = vpop.eup %2388 }
 0x4f0   : > { %903 = vadd.xlane.f32.xlu1 %v2389_v40  ;;  %2068 = vmatmul.mubr.f32.vlgmr.msra.gmra.mxu1 %v2389_v40  ;;  %v3657_v40 = vld [vmem:[#allocation31_spill] sm:$0xff] }
 0x4f1   : > { %2106 = vmatpush3.msra.mxu1 %v3099_v42  ;;  %2137 = vmatprep.mubr.msk.f32.mxu1 %vm2664_vm0, %v2663_v0 }
 0x4f2   : > { %2107 = vmatprep.subr.mxu1 %v2663_v0 }
 0x4f3   : > { %2108 = vmatpush3.msra.mxu1 %v3103_v44 }
 0x4f4   : > { %2109 = vmatprep.subr.mxu1 %v2663_v0 }
 0x4f5   : > { %2110 = vmatpush3.msra.mxu1 %v3111_v46 }
 0x4f6   : > { %2111 = vmatprep.subr.mxu1 %v2663_v0 }
 0x4f7   : > { %2112 = vmatpush3.msra.mxu1 %v3119_v48 }
 0x4f8   : > { %2113 = vmatprep.subr.mxu1 %v2663_v0 }
 0x4f9   : > { %2114 = vmatpush3.msra.mxu1 %v3127_v50 }
 0x4fa   : > { %2115 = vmatprep.subr.mxu1 %v2663_v0 }
 0x4fb   : > { %2116 = vmatpush3.msra.mxu1 %v3135_v52 }
 0x4fc   : > { %2117 = vmatprep.subr.mxu1 %v2663_v0 }
 0x4fd   : > { %2118 = vmatpush3.msra.mxu1 %v3143_v54 }
 0x4fe   : > { %2119 = vmatprep.subr.mxu1 %v2663_v0 }
 0x4ff   : > { %2120 = vmatpush3.msra.mxu1 %v3151_v56 }
 0x500   : > { %2121 = vmatprep.subr.mxu1 %v2663_v0 }
 0x501   : > { %2122 = vmatpush3.msra.mxu1 %v3159_v58 }
 0x502   : > { %2123 = vmatprep.subr.mxu1 %v2663_v0 }
 0x503   : > { %2124 = vmatpush3.msra.mxu1 %v3167_v60 }
 0x504   : > { %2125 = vmatprep.subr.mxu1 %v2663_v0 }
 0x505   : > { %2126 = vmatpush3.msra.mxu1 %v3175_v62 }
 0x506   : > { %2127 = vmatprep.subr.mxu1 %v2663_v0 }
 0x507   : > { %2128 = vmatpush3.msra.mxu1 %v3657_v40 }
 0x508   : > { %2129 = vmatprep.subr.mxu1 %v2663_v0 }
 0x509   : > { %2130 = vmatpush3.msra.mxu1 %v3658_v13 }
 0x50a   : > { %2131 = vmatprep.subr.mxu1 %v2663_v0 }
 0x50b   : > { %2132 = vmatpush3.msra.mxu1 %v3659_v14 }
 0x50c   : > { %2133 = vmatprep.subr.mxu1 %v2663_v0 }
 0x50d   : > { %2134 = vmatpush3.msra.mxu1 %v3207_v41 }
 0x50e   : > { %2135 = vmatprep.subr.mxu1 %v2663_v0 }
 0x50f   : > { %2136 = vmatpush3.msra.mxu1 %v3217_v26 }
 0x510   : > { %2138 = vmatmul.mubr.f32.vlgmr.msra.gmra.mxu1 %v3302_v15  ;;  %2175 = vmatprep.subr.mxu1 %v2663_v0  ;;  %v3660_v15 = vld [vmem:[#allocation27_spill] sm:$0xff] }
 0x511   : > { %2176 = vmatpush3.msra.mxu1 %v3012_v18  ;;  %2207 = vmatprep.mubr.msk.f32.mxu1 %vm2664_vm0, %v2663_v0  ;;  %v3661_v18 = vld [vmem:[#allocation28_spill] sm:$0xff] }
 0x512   : > { %2177 = vmatprep.subr.mxu1 %v2663_v0 }
 0x513   : > { %2178 = vmatpush3.msra.mxu1 %v3015_v19  ;;  %v3662_v19 = vld [vmem:[#allocation29_spill] sm:$0xff] }
 0x514   : > { %2179 = vmatprep.subr.mxu1 %v2663_v0 }
 0x515   : > { %2180 = vmatpush3.msra.mxu1 %v3020_v20  ;;  %v3663_v20 = vld [vmem:[#allocation30_spill] sm:$0xff] }
 0x516   : > { %2181 = vmatprep.subr.mxu1 %v2663_v0 }
 0x517   : > { %2182 = vmatpush3.msra.mxu1 %v3025_v21 }
 0x518   : > { %2183 = vmatprep.subr.mxu1 %v2663_v0 }
 0x519   : > { %2184 = vmatpush3.msra.mxu1 %v3030_v22 }
 0x51a   : > { %2185 = vmatprep.subr.mxu1 %v2663_v0 }
 0x51b   : > { %2186 = vmatpush3.msra.mxu1 %v3035_v23 }
 0x51c   : > { %2187 = vmatprep.subr.mxu1 %v2663_v0 }
 0x51d   : > { %2188 = vmatpush3.msra.mxu1 %v3040_v24 }
 0x51e   : > { %2189 = vmatprep.subr.mxu1 %v2663_v0 }
 0x51f   : > { %2190 = vmatpush3.msra.mxu1 %v3053_v29 }
 0x520   : > { %2191 = vmatprep.subr.mxu1 %v2663_v0 }
 0x521   : > { %2192 = vmatpush3.msra.mxu1 %v3058_v30 }
 0x522   : > { %2193 = vmatprep.subr.mxu1 %v2663_v0 }
 0x523   : > { %2194 = vmatpush3.msra.mxu1 %v3660_v15 }
 0x524   : > { %2195 = vmatprep.subr.mxu1 %v2663_v0 }
 0x525   : > { %2196 = vmatpush3.msra.mxu1 %v3661_v18 }
 0x526   : > { %2197 = vmatprep.subr.mxu1 %v2663_v0 }
 0x527   : > { %2198 = vmatpush3.msra.mxu1 %v3662_v19 }
 0x528   : > { %2199 = vmatprep.subr.mxu1 %v2663_v0 }
 0x529   : > { %2200 = vmatpush3.msra.mxu1 %v3663_v20 }
 0x52a   : > { %2201 = vmatprep.subr.mxu1 %v2663_v0 }
 0x52b   : > { %2202 = vmatpush3.msra.mxu1 %v3081_v35 }
 0x52c   : > { %2203 = vmatprep.subr.mxu1 %v2663_v0 }
 0x52d   : > { %2204 = vmatpush3.msra.mxu1 %v3086_v36 }
 0x52e   : > { %2205 = vmatprep.subr.mxu1 %v2663_v0 }
 0x52f   : > { %2206 = vmatpush3.msra.mxu1 %v3091_v37 }
 0x530   : > { %2245 = vmatprep.subr.mxu1 %v2663_v0 }
 0x579   : > { %v904_v21 = vpop.xlane.xlu1 %903 }
 0x57a   : > { %2390 = vrcp.f32 %v904_v21 }
 0x587   : > { %v2391_v22 = vpop.eup %2390 }
 0x5b0   : > { %v973_v23 = vpop.f32.mrf.mxu1 }
 0x5b1   : > { %v977_v24 = vmul.f32 %v2391_v22, %v973_v23 }
 0x5b2   : > { %v2069_v29 = vpop.f32.mrf.mxu1 }
 0x5b3   : > { %2103 = vmatmul.mubr.f32.vlgmr.msra.gmra.mxu0 %v977_v24 }
 0x5b4   : > { %2141 = vmatpush3.msra.mxu0 %v2925_v1  ;;  %2172 = vmatprep.mubr.msk.f32.mxu0 %vm2664_vm0, %v2663_v0  ;;  %v3664_v1 = vld [vmem:[#allocation24_spill] sm:$0xff] }
 0x5b5   : > { %2142 = vmatprep.subr.mxu0 %v2663_v0 }
 0x5b6   : > { %2143 = vmatpush3.msra.mxu0 %v2928_v2  ;;  %v3665_v2 = vld [vmem:[#allocation25_spill] sm:$0xff] }
 0x5b7   : > { %2144 = vmatprep.subr.mxu0 %v2663_v0 }
 0x5b8   : > { %2145 = vmatpush3.msra.mxu0 %v2933_v3 }
 0x5b9   : > { %2146 = vmatprep.subr.mxu0 %v2663_v0 }
 0x5ba   : > { %2147 = vmatpush3.msra.mxu0 %v2938_v4  ;;  %v3666_v4 = vld [vmem:[#allocation26_spill] sm:$0xff] }
 0x5bb   : > { %2148 = vmatprep.subr.mxu0 %v2663_v0 }
 0x5bc   : > { %2149 = vmatpush3.msra.mxu0 %v2943_v5 }
 0x5bd   : > { %2150 = vmatprep.subr.mxu0 %v2663_v0 }
 0x5be   : > { %2151 = vmatpush3.msra.mxu0 %v2948_v6 }
 0x5bf   : > { %2152 = vmatprep.subr.mxu0 %v2663_v0 }
 0x5c0   : > { %2153 = vmatpush3.msra.mxu0 %v2953_v7 }
 0x5c1   : > { %2154 = vmatprep.subr.mxu0 %v2663_v0 }
 0x5c2   : > { %2155 = vmatpush3.msra.mxu0 %v2958_v8 }
 0x5c3   : > { %2156 = vmatprep.subr.mxu0 %v2663_v0 }
 0x5c4   : > { %2157 = vmatpush3.msra.mxu0 %v2963_v9 }
 0x5c5   : > { %2158 = vmatprep.subr.mxu0 %v2663_v0 }
 0x5c6   : > { %2159 = vmatpush3.msra.mxu0 %v2968_v10 }
 0x5c7   : > { %2160 = vmatprep.subr.mxu0 %v2663_v0 }
 0x5c8   : > { %2161 = vmatpush3.msra.mxu0 %v2973_v11  ;;  %v3667_v11 = vld [vmem:[#allocation34_spill] sm:$0xff] }
 0x5c9   : > { %2162 = vmatprep.subr.mxu0 %v2663_v0 }
 0x5ca   : > { %2163 = vmatpush3.msra.mxu0 %v2978_v12 }
 0x5cb   : > { %2164 = vmatprep.subr.mxu0 %v2663_v0 }
 0x5cc   : > { %2165 = vmatpush3.msra.mxu0 %v3664_v1 }
 0x5cd   : > { %2166 = vmatprep.subr.mxu0 %v2663_v0 }
 0x5ce   : > { %2167 = vmatpush3.msra.mxu0 %v3665_v2 }
 0x5cf   : > { %2168 = vmatprep.subr.mxu0 %v2663_v0 }
 0x5d0   : > { %v1114_v3 = vpop.f32.mrf.mxu1  ;;  %2169 = vmatpush3.msra.mxu0 %v3666_v4 }
 0x5d1   : > { %2170 = vmatprep.subr.mxu0 %v2663_v0 }
 0x5d2   : > { %v2139_v5 = vpop.f32.mrf.mxu1  ;;  %2171 = vmatpush3.msra.mxu0 %v2998_v16 }
 0x5d3   : > { %2210 = vmatprep.subr.mxu0 %v2663_v0 }
 0x673   : > { %v1044_v6 = vpop.f32.mrf.mxu0 }
 0x674   : > { %v1115_v7 = vadd.f32 %v1114_v3, %v1044_v6 }
 0x675   : > { %v2104_v8 = vpop.f32.mrf.mxu0 }
 0x676   : > { %v1118_v9 = vadd.f32 %v3299_v33, %v1115_v7 }
 0x678   : > { %2392 = vtanh.f32 %v1118_v9 }
 0x685   : > { %v3444_v10 = vpop.eup %2392 }
 0x686   : > { %2173 = vmatmul.mubr.f32.vlgmr.msra.gmra.mxu0 %v3444_v10 }
 0x687   : > { %2211 = vmatpush3.msra.mxu0 %v3101_v43  ;;  %2242 = vmatprep.mubr.msk.f32.mxu0 %vm2664_vm0, %v2663_v0 }
 0x688   : > { %2212 = vmatprep.subr.mxu0 %v2663_v0 }
 0x689   : > { %2213 = vmatpush3.msra.mxu0 %v3107_v45 }
 0x68a   : > { %2214 = vmatprep.subr.mxu0 %v2663_v0 }
 0x68b   : > { %2215 = vmatpush3.msra.mxu0 %v3113_v47 }
 0x68c   : > { %2216 = vmatprep.subr.mxu0 %v2663_v0 }
 0x68d   : > { %2217 = vmatpush3.msra.mxu0 %v3121_v49 }
 0x68e   : > { %2218 = vmatprep.subr.mxu0 %v2663_v0 }
 0x68f   : > { %2219 = vmatpush3.msra.mxu0 %v3129_v51 }
 0x690   : > { %2220 = vmatprep.subr.mxu0 %v2663_v0 }
 0x691   : > { %2221 = vmatpush3.msra.mxu0 %v3137_v53 }
 0x692   : > { %2222 = vmatprep.subr.mxu0 %v2663_v0 }
 0x693   : > { %2223 = vmatpush3.msra.mxu0 %v3145_v55 }
 0x694   : > { %2224 = vmatprep.subr.mxu0 %v2663_v0 }
 0x695   : > { %2225 = vmatpush3.msra.mxu0 %v3153_v57 }
 0x696   : > { %2226 = vmatprep.subr.mxu0 %v2663_v0 }
 0x697   : > { %2227 = vmatpush3.msra.mxu0 %v3161_v59 }
 0x698   : > { %2228 = vmatprep.subr.mxu0 %v2663_v0 }
 0x699   : > { %2229 = vmatpush3.msra.mxu0 %v3169_v61 }
 0x69a   : > { %2230 = vmatprep.subr.mxu0 %v2663_v0 }
 0x69b   : > { %2231 = vmatpush3.msra.mxu0 %v3177_v63 }
 0x69c   : > { %2232 = vmatprep.subr.mxu0 %v2663_v0 }
 0x69d   : > { %2233 = vmatpush3.msra.mxu0 %v3185_v27 }
 0x69e   : > { %2234 = vmatprep.subr.mxu0 %v2663_v0 }
 0x69f   : > { %2235 = vmatpush3.msra.mxu0 %v3193_v38 }
 0x6a0   : > { %2236 = vmatprep.subr.mxu0 %v2663_v0 }
 0x6a1   : > { %2237 = vmatpush3.msra.mxu0 %v3667_v11 }
 0x6a2   : > { %2238 = vmatprep.subr.mxu0 %v2663_v0 }
 0x6a3   : > { %2239 = vmatpush3.msra.mxu0 %v3215_v28 }
 0x6a4   : > { %2240 = vmatprep.subr.mxu0 %v2663_v0 }
 0x6a5   : > { %2241 = vmatpush3.msra.mxu0 %v3223_v39 }
 0x746   : > { %v1186_v12 = vpop.f32.mrf.mxu0 }
 0x747   : > { %v1187_v16 = vadd.f32 %v3049_v25, %v1186_v12 }
 0x748   : > { %v2174_v30 = vpop.f32.mrf.mxu0 }
 0x749   : > { %1190 = vmax.xlane.f32.xlu0 %v1187_v16 }
 0x7d2   : > { %v1191_v35 = vpop.xlane.xlu0 %1190 }
 0x7d3   : > { %v1192_v36 = vsub.f32 %v1187_v16, %v1191_v35 }
 0x7d5   : > { %v1193_v37 = vmul.f32 1.442695, %v1192_v36 }
 0x7d7   : > { %2394 = vpow2.f32 %v1193_v37 }
 0x7e4   : > { %v2395_v43 = vpop.eup %2394 }
 0x7e5   : > { %1195 = vadd.xlane.f32.xlu1 %v2395_v43  ;;  %2208 = vmatmul.mubr.f32.vlgmr.msra.gmra.mxu1 %v2395_v43 }
 0x7e6   : > { %2246 = vmatpush3.msra.mxu1 %v3099_v42  ;;  %2277 = vmatprep.mubr.msk.f32.mxu1 %vm2664_vm0, %v2663_v0 }
 0x7e7   : > { %2247 = vmatprep.subr.mxu1 %v2663_v0 }
 0x7e8   : > { %2248 = vmatpush3.msra.mxu1 %v3103_v44 }
 0x7e9   : > { %2249 = vmatprep.subr.mxu1 %v2663_v0 }
 0x7ea   : > { %2250 = vmatpush3.msra.mxu1 %v3111_v46 }
 0x7eb   : > { %2251 = vmatprep.subr.mxu1 %v2663_v0 }
 0x7ec   : > { %2252 = vmatpush3.msra.mxu1 %v3119_v48 }
 0x7ed   : > { %2253 = vmatprep.subr.mxu1 %v2663_v0 }
 0x7ee   : > { %2254 = vmatpush3.msra.mxu1 %v3127_v50 }
 0x7ef   : > { %2255 = vmatprep.subr.mxu1 %v2663_v0 }
 0x7f0   : > { %2256 = vmatpush3.msra.mxu1 %v3135_v52 }
 0x7f1   : > { %2257 = vmatprep.subr.mxu1 %v2663_v0 }
 0x7f2   : > { %2258 = vmatpush3.msra.mxu1 %v3143_v54 }
 0x7f3   : > { %2259 = vmatprep.subr.mxu1 %v2663_v0 }
 0x7f4   : > { %2260 = vmatpush3.msra.mxu1 %v3151_v56 }
 0x7f5   : > { %2261 = vmatprep.subr.mxu1 %v2663_v0 }
 0x7f6   : > { %2262 = vmatpush3.msra.mxu1 %v3159_v58 }
 0x7f7   : > { %2263 = vmatprep.subr.mxu1 %v2663_v0 }
 0x7f8   : > { %2264 = vmatpush3.msra.mxu1 %v3167_v60 }
 0x7f9   : > { %2265 = vmatprep.subr.mxu1 %v2663_v0 }
 0x7fa   : > { %2266 = vmatpush3.msra.mxu1 %v3175_v62 }
 0x7fb   : > { %2267 = vmatprep.subr.mxu1 %v2663_v0 }
 0x7fc   : > { %2268 = vmatpush3.msra.mxu1 %v3657_v40 }
 0x7fd   : > { %2269 = vmatprep.subr.mxu1 %v2663_v0 }
 0x7fe   : > { %2270 = vmatpush3.msra.mxu1 %v3658_v13 }
 0x7ff   : > { %2271 = vmatprep.subr.mxu1 %v2663_v0 }
 0x800   : > { %2272 = vmatpush3.msra.mxu1 %v3659_v14 }
 0x801   : > { %2273 = vmatprep.subr.mxu1 %v2663_v0 }
 0x802   : > { %2274 = vmatpush3.msra.mxu1 %v3207_v41 }
 0x803   : > { %2275 = vmatprep.subr.mxu1 %v2663_v0 }
 0x804   : > { %2276 = vmatpush3.msra.mxu1 %v3217_v26 }
 0x805   : > { %2278 = vmatmul.mubr.f32.vlgmr.msra.gmra.mxu1 %v3444_v10 }
 0x86e   : > { %v1196_v25 = vpop.xlane.xlu1 %1195 }
 0x86f   : > { %2396 = vrcp.f32 %v1196_v25 }
 0x87c   : > { %v2397_v42 = vpop.eup %2396 }
 0x87d   : > { %v1412_v44 = vmul.f32 %v2397_v42, %v2395_v43 }
 0x87f   : > { %1414 = vst [vmem:[%s456_s22] sm:$0xff] %v1412_v44 }
 0x8a5   : > { %v1265_v45 = vpop.f32.mrf.mxu1 }
 0x8a6   : > { %v1269_v46 = vmul.f32 %v2397_v42, %v1265_v45 }
 0x8a7   : > { %v2209_v47 = vpop.f32.mrf.mxu1 }
 0x8a8   : > { %2243 = vmatmul.mubr.f32.vlgmr.msra.gmra.mxu0 %v1269_v46 }
 0x8c5   : > { %v1406_v48 = vpop.f32.mrf.mxu1 }
 0x8c7   : > { %v2279_v49 = vpop.f32.mrf.mxu1 }
 0x8c8   : > { %2549 = shalt.err (!%p2546_p6)
}
 0x8c9   : > { %s2550_s12 = scalar_lea.hbm %s1447_s26, 128  ;;  %s2554_s11 = scalar_lea.hbm %s3669_s23, 256 }
 0x8ca   : > { %p2551_p1 = scmp.ne.s32.totalorder %s1447_s26, %s2550_s12  ;;  %p2555_p10 = scmp.lt.s32.totalorder %s1447_s26, %s3669_s23 }
 0x8cb   : > { %p2556_p12 = scmp.lt.s32.totalorder %s2554_s11, %s2550_s12 }
 0x8cc   : > { %p2552_p2 = pnand %p2551_p1, %p2764_p8 }
 0x8cd   : > { %p2557_p9 = por %p2556_p12, %p2555_p10 }
 0x8ce   : > { %p2553_p4 = pneg %p2552_p2 }
 0x8d0   : > { %p2558_p7 = pnand %p2557_p9, %p2553_p4 }
 0x8d2   : > { %2561 = shalt.err (!%p2558_p7)
}
 0x8d3   : > { %2295 = dma.vmem_to_hbm [thread:$0]  (%p2764_p8), %s1450_s14, 128, %s1447_s26, %s1421_s2  }
 0x8d4   : > { %s449_s21 = scalar_lea.vmem [#allocation11], %s2896_s25  ;;  %s3670_s13 = sld [smem:[#allocation38_spill]] }
 0x8d5   : > { %s1435_s22 = sshll.u32 %s449_s21, 4  ;;  %s1416_s1 = scalar_lea.sflag [#allocation4], %s2893_s24  ;;  %s1436_s22 = int_to_ptr.vmem [resolvable:$true] %s1435_s22 }
 0x8d6   : > { %s2562_s18 = scalar_lea.vmem %s1436_s22, 128  ;;  %s2666_s26 = smov [#allocation11]  }
 0x8d7   : > { %p2563_p5 = scmp.ne.s32.totalorder %s1436_s22, %s2562_s18  ;;  %s2566_s14 = sshll.u32 %s2666_s26, 4  ;;  %s2567_s14 = int_to_ptr.vmem [resolvable:$false] %s2566_s14 }
 0x8d8   : > { %s2568_s25 = scalar_lea.vmem %s2567_s14, 256  ;;  %p2569_p3 = scmp.lt.s32.totalorder %s1436_s22, %s2567_s14 }
 0x8d9   : > { %p2564_p11 = pnand %p2563_p5, %p2764_p8  ;;  %p2570_p0 = scmp.lt.s32.totalorder %s2568_s25, %s2562_s18 }
 0x8da   : > { %s3542_s27 = scalar_lea.hbm %s3670_s13, %s1650_s7 }
 0x8db   : > { %p2565_p13 = pneg %p2564_p11  ;;  %p2571_p6 = por %p2570_p0, %p2569_p3 }
 0x8dd   : > { %p2572_p1 = pnand %p2571_p6, %p2565_p13 }
 0x968   : > { %v1336_v0 = vpop.f32.mrf.mxu0 }
 0x969   : > { %v1407_v50 = vadd.f32 %v1406_v48, %v1336_v0 }
 0x96a   : > { %v2244_v51 = vpop.f32.mrf.mxu0 }
 0x96b   : > { %v1410_v52 = vadd.f32 %v3299_v33, %v1407_v50 }
 0x96d   : > { %2398 = vtanh.f32 %v1410_v52 }
 0x97a   : > { %v2399_v53 = vpop.eup %2398 }
 0x97b   : > { %1413 = vst [vmem:[%s449_s21] sm:$0xff] %v2399_v53 }
 0x97c   : > { %2575 = shalt.err (!%p2572_p1)
}
 0x97d   : > { %s2576_s30 = scalar_lea.hbm %s3542_s27, 128  ;;  %s2580_s2 = scalar_lea.hbm %s3670_s13, 256 }
 0x97e   : > { %p2577_p2 = scmp.ne.s32.totalorder %s3542_s27, %s2576_s30  ;;  %p2581_p12 = scmp.lt.s32.totalorder %s3542_s27, %s3670_s13 }
 0x97f   : > { %p2582_p9 = scmp.lt.s32.totalorder %s2580_s2, %s2576_s30 }
 0x980   : > { %p2578_p4 = pnand %p2577_p2, %p2764_p8 }
 0x981   : > { %p2583_p7 = por %p2582_p9, %p2581_p12 }
 0x982   : > { %p2579_p10 = pneg %p2578_p4 }
 0x984   : > { %p2584_p5 = pnand %p2583_p7, %p2579_p10 }
 0x986   : > { %2587 = shalt.err (!%p2584_p5)
}
 0x987   : > { %2294 = dma.vmem_to_hbm [thread:$0]  (%p2764_p8), %s1436_s22, 128, %s3542_s27, %s1416_s1  }
 0x988 PF: > { %s3671_s17 = sld [smem:[#allocation19_spill]]  ;;  %p3674_p13 = scmp.ge.s32.totalorder %s2654_s10, 2 }
 0x989   : > { %s3672_s11 = sld [smem:[#allocation21_spill]] }
 0x98e   : > { %s1461_s15 = sand.u32 1, %s3671_s17  }
 0x98f   : > { %p3673_p11 = scmp.ne.s32.totalorder %s3672_s11, 0  ;;  %s1462_s20 = scalar_lea.sflag [#allocation4], %s1461_s15 }
 0x991   : > { %p2316_p3 = pnand %p3674_p13, %p3673_p11 }
 0x993   : > { %p2317_p0 = pneg %p2316_p3 }
 0x995   : > { %2625 = dma.done.wait (%p2317_p0), %s1462_s20, 128  }
 0x996   : > { %2627 = vsyncadd (%p2317_p0), %s1462_s20, 4294967168  ;;  %s1471_s21 = scalar_lea.sflag [#allocation13], %s1461_s15 }
 0x997   : > { %2629 = dma.done.wait (%p2317_p0), %s1471_s21, 128  }
 0x998   : > { %2631 = vsyncadd (%p2317_p0), %s1471_s21, 4294967168  ;;  %s32_s10 = sadd.s32 1, %s2654_s10   ;;  %s3675_s16 = sld [smem:[#allocation23_spill]] }
 0x999   : > { %p29_p6 = scmp.ge.s32.totalorder %s32_s10, 4   ;;  %s3676_s22 = sld [smem:[#allocation22_spill]] }
 0x99a   : > { %s3677_s27 = smov %s2638_s28  ;;  %s3678_s28 = smov %s2642_s29 }
 0x99b   : > { %s3680_s30 = smov %s2650_s9  ;;  %31 = sbr.rel (!%p29_p6) target bundleno = 17 (0x11), region = 142 }
 0x99e   : > { %s3679_s29 = smov %s3675_s16 }
 0x99f   : > { %s3681_s9 = smov %s3676_s22 }
 0x9a0   :  { %1476 = vsyncpa [#allocation3], 1 }
 0x9a1   :  { %1478 = vsyncpa [#allocation3 + $0x1], 1 }
 0x9a2   :  { %1479 = vsyncpa [#allocation6], 1 }
 0x9a3   :  { %1481 = vsyncpa [#allocation6 + $0x1], 1 }
 0x9a4   :  { %1482 = vsyncpa [#allocation9], 1 }
 0x9a5   :  { %1483 = vsyncpa [#allocation4], 1 }
 0x9a6   :  { %1485 = vsyncpa [#allocation4 + $0x1], 1 }
 0x9a7   :  { %1486 = vsyncpa [#allocation13], 1 }
 0x9a8   :  { %1488 = vsyncpa [#allocation13 + $0x1], 1 }

</bundles_post_ra>
